<compile_context>
chip_gen: v7x
topology: tpu7x:2x2x1
jax: 0.10.0
libtpu: 0.0.40
codegen_flags: <defaults>
</compile_context>

<pallas_src>
import functools
import math

import numpy as np
import jax
import jax.numpy as jnp
from jax.experimental import pallas as pl
from jax.experimental.pallas import tpu as pltpu


# ----------------------------------------------------------------------------
# Fused kernel: conv1 -> BN+LeakyReLU -> conv2 -> BN+LeakyReLU -> maxpool2x2
# ----------------------------------------------------------------------------
def _contracting_block_kernel(x_ref, w1_ref, b1_ref, w2_ref, b2_ref, g_ref, bt_ref,
                              csum_ref, psel_ref, o_ref, pad1_ref, pad2_ref,
                              *, N, H, W, C1, C2, use_bn, eps, neg_slope):
    R = N * H                      # folded row count
    K1 = W * C1                    # folded lane width of the conv1 input
    K2 = W * C2                    # folded lane width of the conv1/conv2 output
    Ho = H // 2
    inv_cnt = 1.0 / float(N * H * W)

    def banded_conv(pad_ref, w_ref, bias_row, k):
        # 3x3 conv (padding=1) as three lane-dense MXU matmuls:
        #   out[(n,y), x*Cout+co] = sum_dy  slab_dy @ B[dy]
        # where slab_dy = pad[:, dy:dy+H, :] folded to (N*H, W*Cin) and B[dy] is a
        # block-banded matrix that bakes in the dx taps and the left/right zero pad.
        # Operands go to bf16 only at the MXU boundary; accumulation stays f32.
        xp = pad_ref[...]
        acc = None
        for dy in range(3):
            slab = xp[:, dy:dy + H, :].reshape(R, k).astype(jnp.bfloat16)
            part = jnp.dot(slab, w_ref[dy], preferred_element_type=jnp.float32)
            acc = part if acc is None else acc + part
        return acc + bias_row                                        # (R, K2) f32

    def bn_lrelu(z):
        # Training-mode BatchNorm (batch stats, biased variance), one-pass E[x]/E[x^2],
        # fused with LeakyReLU(0.2).  The per-channel fold over the W lane-groups is an
        # exact 0/1 selection matmul (idle MXU) instead of a lane<->sublane relayout;
        # the broadcast back is a cheap lane concat.  All math in f32.
        if use_bn:
            s1 = jnp.sum(z, axis=0, keepdims=True)                    # (1, K2)
            s2 = jnp.sum(z * z, axis=0, keepdims=True)                # (1, K2)
            s1c = jnp.dot(s1, csum_ref[...], preferred_element_type=jnp.float32)  # (1, C2)
            s2c = jnp.dot(s2, csum_ref[...], preferred_element_type=jnp.float32)  # (1, C2)
            mean = s1c * inv_cnt
            var = s2c * inv_cnt - mean * mean
            scale_c = g_ref[...] * jax.lax.rsqrt(var + eps)           # (1, C2)
            shift_c = bt_ref[...] - mean * scale_c                    # (1, C2)
            scale_f = jnp.concatenate([scale_c] * W, axis=1)          # (1, K2)
            shift_f = jnp.concatenate([shift_c] * W, axis=1)          # (1, K2)
            z = z * scale_f + shift_f
        return jnp.maximum(z, neg_slope * z)                          # LeakyReLU(0.2)

    # ---- conv1: fold x into the vertically zero-padded scratch -----------------------
    # Only the 1-row top/bottom borders are zeroed; the interior is written exactly once.
    zrow1 = jnp.zeros((N, 1, K1), jnp.float32)
    pad1_ref[:, pl.ds(0, 1), :] = zrow1
    pad1_ref[:, pl.ds(H + 1, 1), :] = zrow1
    pad1_ref[:, pl.ds(1, H), :] = x_ref[...]
    a1 = bn_lrelu(banded_conv(pad1_ref, w1_ref, b1_ref[...], K1))     # (R, K2)

    # ---- conv2: activation never leaves VMEM ------------------------------------------
    zrow2 = jnp.zeros((N, 1, K2), jnp.float32)
    pad2_ref[:, pl.ds(0, 1), :] = zrow2
    pad2_ref[:, pl.ds(H + 1, 1), :] = zrow2
    pad2_ref[:, pl.ds(1, H), :] = a1.reshape(N, H, K2)
    a2 = bn_lrelu(banded_conv(pad2_ref, w2_ref, b2_ref[...], K2))     # (R, K2)

    # ---- 2x2 max pool, stride 2, in the folded (rows, W*C2) layout ---------------------
    # H-pool: regroup rows into (even, odd) pairs (lane dim untouched) and take the max.
    t = a2.reshape(N, Ho, 2, K2)
    hmax = jnp.maximum(t[:, :, 0, :], t[:, :, 1, :]).reshape(N * Ho, K2)
    # W-pool: compare every column group with its right neighbour via two static lane
    # slices, then compact the even groups with an exact 0/1 selection matmul.
    wmax = jnp.maximum(hmax[:, :K2 - C2], hmax[:, C2:])               # (N*Ho, K2-C2)
    pooled = jnp.dot(wmax, psel_ref[...], preferred_element_type=jnp.float32)
    o_ref[...] = pooled.astype(o_ref.dtype)                           # (N*Ho, Wo*C2), lane-dense


@functools.partial(jax.jit, static_argnames=("use_bn", "eps", "neg_slope"))
def contracting_block_forward(x_nhwc, w1b, b1f, w2b, b2f, gamma, beta, csum, poolsel,
                              *, use_bn=True, eps=1e-5, neg_slope=0.2):
    N, H, W, C1 = x_nhwc.shape
    C2 = w1b.shape[2] // W
    Ho, Wo = H // 2, W // 2

    # Free layout plumbing only (no transposes): fold W into the lane axis.
    xf = x_nhwc.reshape(N, H, W * C1).astype(jnp.float32)

    kernel = functools.partial(
        _contracting_block_kernel, N=N, H=H, W=W, C1=C1, C2=C2,
        use_bn=use_bn, eps=eps, neg_slope=neg_slope)

    out2d = pl.pallas_call(
        kernel,
        out_shape=jax.ShapeDtypeStruct((N * Ho, Wo * C2), jnp.float32),
        grid=(1,),
        in_specs=[
            pl.BlockSpec((N, H, W * C1), lambda i: (0, 0, 0)),          # x, folded NHWC
            pl.BlockSpec((3, W * C1, W * C2), lambda i: (0, 0, 0)),     # conv1 banded weights (bf16)
            pl.BlockSpec((1, W * C2), lambda i: (0, 0)),                # conv1 bias, tiled over W
            pl.BlockSpec((3, W * C2, W * C2), lambda i: (0, 0, 0)),     # conv2 banded weights (bf16)
            pl.BlockSpec((1, W * C2), lambda i: (0, 0)),                # conv2 bias, tiled over W
            pl.BlockSpec((1, C2), lambda i: (0, 0)),                    # BN gamma
            pl.BlockSpec((1, C2), lambda i: (0, 0)),                    # BN beta
            pl.BlockSpec((W * C2, C2), lambda i: (0, 0)),               # BN channel-sum selector
            pl.BlockSpec(((W - 1) * C2, Wo * C2), lambda i: (0, 0)),    # pool compaction selector
        ],
        out_specs=pl.BlockSpec((N * Ho, Wo * C2), lambda i: (0, 0)),
        scratch_shapes=[
            pltpu.VMEM((N, H + 2, W * C1), jnp.float32),                # conv1 vertically padded input
            pltpu.VMEM((N, H + 2, W * C2), jnp.float32),                # conv2 vertically padded input
        ],
        compiler_params=pltpu.CompilerParams(
            dimension_semantics=("arbitrary",),
            vmem_limit_bytes=32 * 1024 * 1024,
        ),
    )(xf, w1b, b1f, w2b, b2f, gamma, beta, csum, poolsel)

    return out2d.reshape(N, Ho, Wo, C2)                                # free reshape, NHWC out


# ----------------------------------------------------------------------------
# Host-side (init-time) construction of the banded / selection matrices.
# ----------------------------------------------------------------------------
def _banded_conv_matrix(w_oihw, width):
    """B[dy][(xx*Cin + ci), (x*Cout + co)] = w[co, ci, dy, xx-x+1] (zero outside the band).

    The dx taps and the left/right zero padding of the 3x3 conv are baked into the band
    structure, so the kernel only ever needs vertical (top/bottom) zero padding.
    """
    w = np.asarray(w_oihw, np.float32)                     # (Cout, Cin, 3, 3)
    cout, cin = w.shape[0], w.shape[1]
    B = np.zeros((3, width * cin, width * cout), np.float32)
    for dy in range(3):
        for dx in range(3):
            for x in range(width):
                xx = x + dx - 1
                if 0 <= xx < width:
                    B[dy, xx * cin:(xx + 1) * cin, x * cout:(x + 1) * cout] = w[:, :, dy, dx].T
    return B


# ----------------------------------------------------------------------------
# Module wrapper with deterministic torch-style parameter init + JAX reference.
# ----------------------------------------------------------------------------
class ContractingBlockPallas:
    """Pallas port of the PyTorch ContractingBlock (training-mode BatchNorm).

    I/O is NHWC (TPU-native) instead of torch's NCHW -- same math per channel,
    no activation transposes anywhere.
    """

    def __init__(self, input_channels, key, use_dropout=False, use_bn=True):
        c_in, c_out = input_channels, 2 * input_channels
        k1, k2 = jax.random.split(key, 2)

        def conv_init(k, cin, cout, ksize=3):
            fan_in = cin * ksize * ksize
            bound = 1.0 / math.sqrt(fan_in)
            kw_, kb_ = jax.random.split(k)
            w = jax.random.uniform(kw_, (cout, cin, ksize, ksize), jnp.float32, -bound, bound)
            b = jax.random.uniform(kb_, (cout,), jnp.float32, -bound, bound)
            return w, b

        self.w1_oihw, self.b1 = conv_init(k1, c_in, c_out)
        self.w2_oihw, self.b2 = conv_init(k2, c_out, c_out)
        self.w1_hwio = jnp.transpose(self.w1_oihw, (2, 3, 1, 0))   # for the XLA reference only
        self.w2_hwio = jnp.transpose(self.w2_oihw, (2, 3, 1, 0))

        self.c_in, self.c_out = c_in, c_out
        self.use_bn, self.use_dropout = use_bn, use_dropout
        self.gamma = jnp.ones((c_out,), jnp.float32)
        self.beta = jnp.zeros((c_out,), jnp.float32)
        self._cache = {}
        # TODO(synk): training-mode nn.Dropout (use_dropout=True) and BatchNorm
        # running_mean/running_var buffer updates are not implemented (batch-stats
        # forward only, like the torch module in train mode).

    def _prepared(self, width):
        """Banded weights / folded biases / selection matrices for a given image width."""
        if width in self._cache:
            return self._cache[width]
        c2 = self.c_out
        wo = width // 2
        csum = np.tile(np.eye(c2, dtype=np.float32), (width, 1))          # (W*C2, C2)
        psel = np.zeros(((width - 1) * c2, wo * c2), np.float32)          # pool compaction
        for x_out in range(wo):
            for c in range(c2):
                psel[2 * x_out * c2 + c, x_out * c2 + c] = 1.0
        prep = dict(
            w1b=jnp.asarray(_banded_conv_matrix(self.w1_oihw, width), jnp.bfloat16),
            w2b=jnp.asarray(_banded_conv_matrix(self.w2_oihw, width), jnp.bfloat16),
            b1f=jnp.asarray(np.tile(np.asarray(self.b1), width)[None, :], jnp.float32),
            b2f=jnp.asarray(np.tile(np.asarray(self.b2), width)[None, :], jnp.float32),
            csum=jnp.asarray(csum), poolsel=jnp.asarray(psel))
        self._cache[width] = prep
        return prep

    def __call__(self, x_nhwc):
        N, H, W, C = x_nhwc.shape
        assert C == self.c_in and H % 2 == 0 and W % 2 == 0
        p = self._prepared(W)
        return contracting_block_forward(
            x_nhwc, p["w1b"], p["b1f"], p["w2b"], p["b2f"],
            self.gamma.reshape(1, -1), self.beta.reshape(1, -1),
            p["csum"], p["poolsel"], use_bn=self.use_bn)

    def reference(self, x_nhwc, eps=1e-5):
        """Pure-JAX (XLA) reference of the same forward, NHWC.  Conv operands are
        rounded to bf16 to match the kernel's MXU input precision (accumulation f32)."""
        def conv(x, w_hwio, b):
            xb = x.astype(jnp.bfloat16).astype(jnp.float32)
            wb = w_hwio.astype(jnp.bfloat16).astype(jnp.float32)
            y = jax.lax.conv_general_dilated(
                xb, wb, window_strides=(1, 1), padding=((1, 1), (1, 1)),
                dimension_numbers=("NHWC", "HWIO", "NHWC"),
                precision=jax.lax.Precision.HIGHEST)
            return y + b.reshape(1, 1, 1, -1)

        def bn(x):
            if not self.use_bn:
                return x
            mean = jnp.mean(x, axis=(0, 1, 2), keepdims=True)
            var = jnp.mean((x - mean) ** 2, axis=(0, 1, 2), keepdims=True)
            xh = (x - mean) * jax.lax.rsqrt(var + eps)
            return xh * self.gamma.reshape(1, 1, 1, -1) + self.beta.reshape(1, 1, 1, -1)

        def lrelu(x):
            return jnp.where(x > 0, x, 0.2 * x)

        x = lrelu(bn(conv(x_nhwc, self.w1_hwio, self.b1)))
        x = lrelu(bn(conv(x, self.w2_hwio, self.b2)))
        return jax.lax.reduce_window(
            x, jnp.array(-jnp.inf, x.dtype), jax.lax.max,
            (1, 2, 2, 1), (1, 2, 2, 1), "VALID")


if __name__ == "__main__":
    key = jax.random.PRNGKey(0)
    k_x, k_p = jax.random.split(key)

    N, C, H, W = 2, 4, 16, 16
    x = jax.random.normal(k_x, (N, H, W, C), jnp.float32)          # NHWC, TPU-native layout

    block = ContractingBlockPallas(C, k_p, use_dropout=False, use_bn=True)
    out = jax.block_until_ready(block(x))

    assert out.shape == (N, H // 2, W // 2, 2 * C), out.shape
    assert bool(jnp.all(jnp.isfinite(out)))

    ref = jax.block_until_ready(block.reference(x))
    max_err = float(jnp.max(jnp.abs(out - ref)))
    assert max_err < 2e-2, f"kernel vs reference mismatch: max abs err = {max_err}"

    print("KERNEL_OK")
</pallas_src>

<mosaic_0001>
module attributes {stable_mosaic.version = 11 : i64} {
  func.func @_contracting_block_kernel(%arg0: i32, %arg1: memref<2x16x64xf32, #tpu.memory_space<vmem>>, %arg2: memref<3x64x128xbf16, #tpu.memory_space<vmem>>, %arg3: memref<1x128xf32, #tpu.memory_space<vmem>>, %arg4: memref<3x128x128xbf16, #tpu.memory_space<vmem>>, %arg5: memref<1x128xf32, #tpu.memory_space<vmem>>, %arg6: memref<1x8xf32, #tpu.memory_space<vmem>>, %arg7: memref<1x8xf32, #tpu.memory_space<vmem>>, %arg8: memref<128x8xf32, #tpu.memory_space<vmem>>, %arg9: memref<120x64xf32, #tpu.memory_space<vmem>>, %arg10: memref<16x64xf32, #tpu.memory_space<vmem>>, %arg11: memref<2x18x64xf32, #tpu.memory_space<vmem>>, %arg12: memref<2x18x128xf32, #tpu.memory_space<vmem>>) attributes {dimension_semantics = [#tpu.dimension_semantics<arbitrary>], iteration_bounds = array<i64: 1>, scalar_prefetch = 0 : i64, scratch_operands = 2 : i64, tpu.core_type = #tpu.core_type<tc>, window_params = [{pipeline_mode = #tpu.pipeline_mode<synchronous>, transform_indices = @transform_0, window_bounds = array<i64: 2, 16, 64>}, {pipeline_mode = #tpu.pipeline_mode<synchronous>, transform_indices = @transform_1, window_bounds = array<i64: 3, 64, 128>}, {pipeline_mode = #tpu.pipeline_mode<synchronous>, transform_indices = @transform_2, window_bounds = array<i64: 1, 128>}, {pipeline_mode = #tpu.pipeline_mode<synchronous>, transform_indices = @transform_3, window_bounds = array<i64: 3, 128, 128>}, {pipeline_mode = #tpu.pipeline_mode<synchronous>, transform_indices = @transform_4, window_bounds = array<i64: 1, 128>}, {pipeline_mode = #tpu.pipeline_mode<synchronous>, transform_indices = @transform_5, window_bounds = array<i64: 1, 8>}, {pipeline_mode = #tpu.pipeline_mode<synchronous>, transform_indices = @transform_6, window_bounds = array<i64: 1, 8>}, {pipeline_mode = #tpu.pipeline_mode<synchronous>, transform_indices = @transform_7, window_bounds = array<i64: 128, 8>}, {pipeline_mode = #tpu.pipeline_mode<synchronous>, transform_indices = @transform_8, window_bounds = array<i64: 120, 64>}, {pipeline_mode = #tpu.pipeline_mode<synchronous>, transform_indices = @transform_9, window_bounds = array<i64: 16, 64>}]} {
    %cst = arith.constant 0.000000e+00 : f32
    %0 = vector.broadcast %cst : f32 to vector<2x1x64xf32>
    %c0 = arith.constant 0 : index
    %c0_0 = arith.constant 0 : index
    %c0_1 = arith.constant 0 : index
    %1 = vector.load %arg11[%c0, %c0_0, %c0_1] : memref<2x18x64xf32, #tpu.memory_space<vmem>>, vector<2x1x64xf32>
    tpu.vector_store %arg11[%c0, %c0_0, %c0_1], %0 {strides = array<i32>} : memref<2x18x64xf32, #tpu.memory_space<vmem>>, vector<2x1x64xf32>,
    %c0_2 = arith.constant 0 : index
    %c17 = arith.constant 17 : index
    %c0_3 = arith.constant 0 : index
    %2 = vector.load %arg11[%c0_2, %c17, %c0_3] : memref<2x18x64xf32, #tpu.memory_space<vmem>>, vector<2x1x64xf32>
    tpu.vector_store %arg11[%c0_2, %c17, %c0_3], %0 {strides = array<i32>} : memref<2x18x64xf32, #tpu.memory_space<vmem>>, vector<2x1x64xf32>,
    %c0_4 = arith.constant 0 : index
    %c0_5 = arith.constant 0 : index
    %c0_6 = arith.constant 0 : index
    %3 = vector.load %arg1[%c0_4, %c0_5, %c0_6] : memref<2x16x64xf32, #tpu.memory_space<vmem>>, vector<2x16x64xf32>
    %c0_7 = arith.constant 0 : index
    %c1 = arith.constant 1 : index
    %c0_8 = arith.constant 0 : index
    %4 = vector.load %arg11[%c0_7, %c1, %c0_8] : memref<2x18x64xf32, #tpu.memory_space<vmem>>, vector<2x16x64xf32>
    tpu.vector_store %arg11[%c0_7, %c1, %c0_8], %3 {strides = array<i32>} : memref<2x18x64xf32, #tpu.memory_space<vmem>>, vector<2x16x64xf32>,
    %c0_9 = arith.constant 0 : index
    %c0_10 = arith.constant 0 : index
    %5 = vector.load %arg3[%c0_9, %c0_10] : memref<1x128xf32, #tpu.memory_space<vmem>>, vector<1x128xf32>
    %c0_11 = arith.constant 0 : index
    %c0_12 = arith.constant 0 : index
    %c0_13 = arith.constant 0 : index
    %6 = vector.load %arg11[%c0_11, %c0_12, %c0_13] : memref<2x18x64xf32, #tpu.memory_space<vmem>>, vector<2x18x64xf32>
    %7 = vector.extract_strided_slice %6 {offsets = [0, 0, 0], sizes = [2, 16, 64], strides = [1, 1, 1]} : vector<2x18x64xf32> to vector<2x16x64xf32>
    %8 = vector.shape_cast %7 : vector<2x16x64xf32> to vector<32x64xf32>
    %9 = arith.truncf %8 : vector<32x64xf32> to vector<32x64xbf16>
    %c0_14 = arith.constant 0 : index
    %c0_15 = arith.constant 0 : index
    %c0_16 = arith.constant 0 : index
    %10 = vector.load %arg2[%c0_14, %c0_15, %c0_16] : memref<3x64x128xbf16, #tpu.memory_space<vmem>>, vector<1x64x128xbf16>
    %11 = vector.shape_cast %10 : vector<1x64x128xbf16> to vector<64x128xbf16>
    %cst_17 = arith.constant dense<0.000000e+00> : vector<32x128xf32>
    %12 = tpu.matmul %9, %11, %cst_17 {dimension_numbers = #tpu.dot_dimension_numbers<[1], [0], [0], [1], [0, 0, 1, 1], [], []>} : vector<32x64xbf16>, vector<64x128xbf16>, vector<32x128xf32> -> vector<32x128xf32>
    %13 = vector.extract_strided_slice %6 {offsets = [0, 1, 0], sizes = [2, 16, 64], strides = [1, 1, 1]} : vector<2x18x64xf32> to vector<2x16x64xf32>
    %14 = vector.shape_cast %13 : vector<2x16x64xf32> to vector<32x64xf32>
    %15 = arith.truncf %14 : vector<32x64xf32> to vector<32x64xbf16>
    %c1_18 = arith.constant 1 : index
    %c0_19 = arith.constant 0 : index
    %c0_20 = arith.constant 0 : index
    %16 = vector.load %arg2[%c1_18, %c0_19, %c0_20] : memref<3x64x128xbf16, #tpu.memory_space<vmem>>, vector<1x64x128xbf16>
    %17 = vector.shape_cast %16 : vector<1x64x128xbf16> to vector<64x128xbf16>
    %cst_21 = arith.constant dense<0.000000e+00> : vector<32x128xf32>
    %18 = tpu.matmul %15, %17, %cst_21 {dimension_numbers = #tpu.dot_dimension_numbers<[1], [0], [0], [1], [0, 0, 1, 1], [], []>} : vector<32x64xbf16>, vector<64x128xbf16>, vector<32x128xf32> -> vector<32x128xf32>
    %19 = arith.addf %12, %18 : vector<32x128xf32>
    %20 = vector.extract_strided_slice %6 {offsets = [0, 2, 0], sizes = [2, 16, 64], strides = [1, 1, 1]} : vector<2x18x64xf32> to vector<2x16x64xf32>
    %21 = vector.shape_cast %20 : vector<2x16x64xf32> to vector<32x64xf32>
    %22 = arith.truncf %21 : vector<32x64xf32> to vector<32x64xbf16>
    %c2 = arith.constant 2 : index
    %c0_22 = arith.constant 0 : index
    %c0_23 = arith.constant 0 : index
    %23 = vector.load %arg2[%c2, %c0_22, %c0_23] : memref<3x64x128xbf16, #tpu.memory_space<vmem>>, vector<1x64x128xbf16>
    %24 = vector.shape_cast %23 : vector<1x64x128xbf16> to vector<64x128xbf16>
    %cst_24 = arith.constant dense<0.000000e+00> : vector<32x128xf32>
    %25 = tpu.matmul %22, %24, %cst_24 {dimension_numbers = #tpu.dot_dimension_numbers<[1], [0], [0], [1], [0, 0, 1, 1], [], []>} : vector<32x64xbf16>, vector<64x128xbf16>, vector<32x128xf32> -> vector<32x128xf32>
    %26 = arith.addf %19, %25 : vector<32x128xf32>
    %27 = vector.broadcast %5 : vector<1x128xf32> to vector<32x128xf32>
    %28 = arith.addf %26, %27 : vector<32x128xf32>
    %cst_25 = arith.constant dense<0.000000e+00> : vector<128xf32>
    %29 = vector.multi_reduction <add>, %28, %cst_25 [0] : vector<32x128xf32> to vector<128xf32>
    %30 = vector.shape_cast %29 : vector<128xf32> to vector<1x128xf32>
    %31 = arith.mulf %28, %28 : vector<32x128xf32>
    %cst_26 = arith.constant dense<0.000000e+00> : vector<128xf32>
    %32 = vector.multi_reduction <add>, %31, %cst_26 [0] : vector<32x128xf32> to vector<128xf32>
    %33 = vector.shape_cast %32 : vector<128xf32> to vector<1x128xf32>
    %c0_27 = arith.constant 0 : index
    %c0_28 = arith.constant 0 : index
    %34 = vector.load %arg8[%c0_27, %c0_28] : memref<128x8xf32, #tpu.memory_space<vmem>>, vector<128x8xf32>
    %cst_29 = arith.constant dense<0.000000e+00> : vector<1x8xf32>
    %35 = tpu.matmul %30, %34, %cst_29 {dimension_numbers = #tpu.dot_dimension_numbers<[1], [0], [0], [1], [0, 0, 1, 1], [], []>} : vector<1x128xf32>, vector<128x8xf32>, vector<1x8xf32> -> vector<1x8xf32>
    %c0_30 = arith.constant 0 : index
    %c0_31 = arith.constant 0 : index
    %36 = vector.load %arg8[%c0_30, %c0_31] : memref<128x8xf32, #tpu.memory_space<vmem>>, vector<128x8xf32>
    %cst_32 = arith.constant dense<0.000000e+00> : vector<1x8xf32>
    %37 = tpu.matmul %33, %36, %cst_32 {dimension_numbers = #tpu.dot_dimension_numbers<[1], [0], [0], [1], [0, 0, 1, 1], [], []>} : vector<1x128xf32>, vector<128x8xf32>, vector<1x8xf32> -> vector<1x8xf32>
    %cst_33 = arith.constant 0.001953125 : f32
    %38 = vector.broadcast %cst_33 : f32 to vector<1x8xf32>
    %39 = arith.mulf %35, %38 : vector<1x8xf32>
    %cst_34 = arith.constant 0.001953125 : f32
    %40 = vector.broadcast %cst_34 : f32 to vector<1x8xf32>
    %41 = arith.mulf %37, %40 : vector<1x8xf32>
    %42 = arith.mulf %39, %39 : vector<1x8xf32>
    %43 = arith.subf %41, %42 : vector<1x8xf32>
    %c0_35 = arith.constant 0 : index
    %c0_36 = arith.constant 0 : index
    %44 = vector.load %arg6[%c0_35, %c0_36] : memref<1x8xf32, #tpu.memory_space<vmem>>, vector<1x8xf32>
    %cst_37 = arith.constant 9.99999974E-6 : f32
    %45 = vector.broadcast %cst_37 : f32 to vector<1x8xf32>
    %46 = arith.addf %43, %45 : vector<1x8xf32>
    %47 = math.rsqrt %46 : vector<1x8xf32>
    %48 = arith.mulf %44, %47 : vector<1x8xf32>
    %c0_38 = arith.constant 0 : index
    %c0_39 = arith.constant 0 : index
    %49 = vector.load %arg7[%c0_38, %c0_39] : memref<1x8xf32, #tpu.memory_space<vmem>>, vector<1x8xf32>
    %50 = arith.mulf %39, %48 : vector<1x8xf32>
    %51 = arith.subf %49, %50 : vector<1x8xf32>
    %52 = tpu.concatenate %48, %48, %48, %48, %48, %48, %48, %48, %48, %48, %48, %48, %48, %48, %48, %48 in 1 : vector<1x8xf32>, vector<1x8xf32>, vector<1x8xf32>, vector<1x8xf32>, vector<1x8xf32>, vector<1x8xf32>, vector<1x8xf32>, vector<1x8xf32>, vector<1x8xf32>, vector<1x8xf32>, vector<1x8xf32>, vector<1x8xf32>, vector<1x8xf32>, vector<1x8xf32>, vector<1x8xf32>, vector<1x8xf32> -> vector<1x128xf32>
    %53 = tpu.concatenate %51, %51, %51, %51, %51, %51, %51, %51, %51, %51, %51, %51, %51, %51, %51, %51 in 1 : vector<1x8xf32>, vector<1x8xf32>, vector<1x8xf32>, vector<1x8xf32>, vector<1x8xf32>, vector<1x8xf32>, vector<1x8xf32>, vector<1x8xf32>, vector<1x8xf32>, vector<1x8xf32>, vector<1x8xf32>, vector<1x8xf32>, vector<1x8xf32>, vector<1x8xf32>, vector<1x8xf32>, vector<1x8xf32> -> vector<1x128xf32>
    %54 = vector.broadcast %52 : vector<1x128xf32> to vector<32x128xf32>
    %55 = arith.mulf %28, %54 : vector<32x128xf32>
    %56 = vector.broadcast %53 : vector<1x128xf32> to vector<32x128xf32>
    %57 = arith.addf %55, %56 : vector<32x128xf32>
    %cst_40 = arith.constant 2.000000e-01 : f32
    %58 = vector.broadcast %cst_40 : f32 to vector<32x128xf32>
    %59 = arith.mulf %58, %57 : vector<32x128xf32>
    %60 = arith.maximumf %57, %59 : vector<32x128xf32>
    %cst_41 = arith.constant 0.000000e+00 : f32
    %61 = vector.broadcast %cst_41 : f32 to vector<2x1x128xf32>
    %c0_42 = arith.constant 0 : index
    %c0_43 = arith.constant 0 : index
    %c0_44 = arith.constant 0 : index
    %62 = vector.load %arg12[%c0_42, %c0_43, %c0_44] : memref<2x18x128xf32, #tpu.memory_space<vmem>>, vector<2x1x128xf32>
    tpu.vector_store %arg12[%c0_42, %c0_43, %c0_44], %61 {strides = array<i32>} : memref<2x18x128xf32, #tpu.memory_space<vmem>>, vector<2x1x128xf32>,
    %c0_45 = arith.constant 0 : index
    %c17_46 = arith.constant 17 : index
    %c0_47 = arith.constant 0 : index
    %63 = vector.load %arg12[%c0_45, %c17_46, %c0_47] : memref<2x18x128xf32, #tpu.memory_space<vmem>>, vector<2x1x128xf32>
    tpu.vector_store %arg12[%c0_45, %c17_46, %c0_47], %61 {strides = array<i32>} : memref<2x18x128xf32, #tpu.memory_space<vmem>>, vector<2x1x128xf32>,
    %64 = vector.shape_cast %60 : vector<32x128xf32> to vector<2x16x128xf32>
    %c0_48 = arith.constant 0 : index
    %c1_49 = arith.constant 1 : index
    %c0_50 = arith.constant 0 : index
    %65 = vector.load %arg12[%c0_48, %c1_49, %c0_50] : memref<2x18x128xf32, #tpu.memory_space<vmem>>, vector<2x16x128xf32>
    tpu.vector_store %arg12[%c0_48, %c1_49, %c0_50], %64 {strides = array<i32>} : memref<2x18x128xf32, #tpu.memory_space<vmem>>, vector<2x16x128xf32>,
    %c0_51 = arith.constant 0 : index
    %c0_52 = arith.constant 0 : index
    %66 = vector.load %arg5[%c0_51, %c0_52] : memref<1x128xf32, #tpu.memory_space<vmem>>, vector<1x128xf32>
    %c0_53 = arith.constant 0 : index
    %c0_54 = arith.constant 0 : index
    %c0_55 = arith.constant 0 : index
    %67 = vector.load %arg12[%c0_53, %c0_54, %c0_55] : memref<2x18x128xf32, #tpu.memory_space<vmem>>, vector<2x18x128xf32>
    %68 = vector.extract_strided_slice %67 {offsets = [0, 0, 0], sizes = [2, 16, 128], strides = [1, 1, 1]} : vector<2x18x128xf32> to vector<2x16x128xf32>
    %69 = vector.shape_cast %68 : vector<2x16x128xf32> to vector<32x128xf32>
    %70 = arith.truncf %69 : vector<32x128xf32> to vector<32x128xbf16>
    %c0_56 = arith.constant 0 : index
    %c0_57 = arith.constant 0 : index
    %c0_58 = arith.constant 0 : index
    %71 = vector.load %arg4[%c0_56, %c0_57, %c0_58] : memref<3x128x128xbf16, #tpu.memory_space<vmem>>, vector<1x128x128xbf16>
    %72 = vector.shape_cast %71 : vector<1x128x128xbf16> to vector<128x128xbf16>
    %cst_59 = arith.constant dense<0.000000e+00> : vector<32x128xf32>
    %73 = tpu.matmul %70, %72, %cst_59 {dimension_numbers = #tpu.dot_dimension_numbers<[1], [0], [0], [1], [0, 0, 1, 1], [], []>} : vector<32x128xbf16>, vector<128x128xbf16>, vector<32x128xf32> -> vector<32x128xf32>
    %74 = vector.extract_strided_slice %67 {offsets = [0, 1, 0], sizes = [2, 16, 128], strides = [1, 1, 1]} : vector<2x18x128xf32> to vector<2x16x128xf32>
    %75 = vector.shape_cast %74 : vector<2x16x128xf32> to vector<32x128xf32>
    %76 = arith.truncf %75 : vector<32x128xf32> to vector<32x128xbf16>
    %c1_60 = arith.constant 1 : index
    %c0_61 = arith.constant 0 : index
    %c0_62 = arith.constant 0 : index
    %77 = vector.load %arg4[%c1_60, %c0_61, %c0_62] : memref<3x128x128xbf16, #tpu.memory_space<vmem>>, vector<1x128x128xbf16>
    %78 = vector.shape_cast %77 : vector<1x128x128xbf16> to vector<128x128xbf16>
    %cst_63 = arith.constant dense<0.000000e+00> : vector<32x128xf32>
    %79 = tpu.matmul %76, %78, %cst_63 {dimension_numbers = #tpu.dot_dimension_numbers<[1], [0], [0], [1], [0, 0, 1, 1], [], []>} : vector<32x128xbf16>, vector<128x128xbf16>, vector<32x128xf32> -> vector<32x128xf32>
    %80 = arith.addf %73, %79 : vector<32x128xf32>
    %81 = vector.extract_strided_slice %67 {offsets = [0, 2, 0], sizes = [2, 16, 128], strides = [1, 1, 1]} : vector<2x18x128xf32> to vector<2x16x128xf32>
    %82 = vector.shape_cast %81 : vector<2x16x128xf32> to vector<32x128xf32>
    %83 = arith.truncf %82 : vector<32x128xf32> to vector<32x128xbf16>
    %c2_64 = arith.constant 2 : index
    %c0_65 = arith.constant 0 : index
    %c0_66 = arith.constant 0 : index
    %84 = vector.load %arg4[%c2_64, %c0_65, %c0_66] : memref<3x128x128xbf16, #tpu.memory_space<vmem>>, vector<1x128x128xbf16>
    %85 = vector.shape_cast %84 : vector<1x128x128xbf16> to vector<128x128xbf16>
    %cst_67 = arith.constant dense<0.000000e+00> : vector<32x128xf32>
    %86 = tpu.matmul %83, %85, %cst_67 {dimension_numbers = #tpu.dot_dimension_numbers<[1], [0], [0], [1], [0, 0, 1, 1], [], []>} : vector<32x128xbf16>, vector<128x128xbf16>, vector<32x128xf32> -> vector<32x128xf32>
    %87 = arith.addf %80, %86 : vector<32x128xf32>
    %88 = vector.broadcast %66 : vector<1x128xf32> to vector<32x128xf32>
    %89 = arith.addf %87, %88 : vector<32x128xf32>
    %cst_68 = arith.constant dense<0.000000e+00> : vector<128xf32>
    %90 = vector.multi_reduction <add>, %89, %cst_68 [0] : vector<32x128xf32> to vector<128xf32>
    %91 = vector.shape_cast %90 : vector<128xf32> to vector<1x128xf32>
    %92 = arith.mulf %89, %89 : vector<32x128xf32>
    %cst_69 = arith.constant dense<0.000000e+00> : vector<128xf32>
    %93 = vector.multi_reduction <add>, %92, %cst_69 [0] : vector<32x128xf32> to vector<128xf32>
    %94 = vector.shape_cast %93 : vector<128xf32> to vector<1x128xf32>
    %c0_70 = arith.constant 0 : index
    %c0_71 = arith.constant 0 : index
    %95 = vector.load %arg8[%c0_70, %c0_71] : memref<128x8xf32, #tpu.memory_space<vmem>>, vector<128x8xf32>
    %cst_72 = arith.constant dense<0.000000e+00> : vector<1x8xf32>
    %96 = tpu.matmul %91, %95, %cst_72 {dimension_numbers = #tpu.dot_dimension_numbers<[1], [0], [0], [1], [0, 0, 1, 1], [], []>} : vector<1x128xf32>, vector<128x8xf32>, vector<1x8xf32> -> vector<1x8xf32>
    %c0_73 = arith.constant 0 : index
    %c0_74 = arith.constant 0 : index
    %97 = vector.load %arg8[%c0_73, %c0_74] : memref<128x8xf32, #tpu.memory_space<vmem>>, vector<128x8xf32>
    %cst_75 = arith.constant dense<0.000000e+00> : vector<1x8xf32>
    %98 = tpu.matmul %94, %97, %cst_75 {dimension_numbers = #tpu.dot_dimension_numbers<[1], [0], [0], [1], [0, 0, 1, 1], [], []>} : vector<1x128xf32>, vector<128x8xf32>, vector<1x8xf32> -> vector<1x8xf32>
    %cst_76 = arith.constant 0.001953125 : f32
    %99 = vector.broadcast %cst_76 : f32 to vector<1x8xf32>
    %100 = arith.mulf %96, %99 : vector<1x8xf32>
    %cst_77 = arith.constant 0.001953125 : f32
    %101 = vector.broadcast %cst_77 : f32 to vector<1x8xf32>
    %102 = arith.mulf %98, %101 : vector<1x8xf32>
    %103 = arith.mulf %100, %100 : vector<1x8xf32>
    %104 = arith.subf %102, %103 : vector<1x8xf32>
    %c0_78 = arith.constant 0 : index
    %c0_79 = arith.constant 0 : index
    %105 = vector.load %arg6[%c0_78, %c0_79] : memref<1x8xf32, #tpu.memory_space<vmem>>, vector<1x8xf32>
    %cst_80 = arith.constant 9.99999974E-6 : f32
    %106 = vector.broadcast %cst_80 : f32 to vector<1x8xf32>
    %107 = arith.addf %104, %106 : vector<1x8xf32>
    %108 = math.rsqrt %107 : vector<1x8xf32>
    %109 = arith.mulf %105, %108 : vector<1x8xf32>
    %c0_81 = arith.constant 0 : index
    %c0_82 = arith.constant 0 : index
    %110 = vector.load %arg7[%c0_81, %c0_82] : memref<1x8xf32, #tpu.memory_space<vmem>>, vector<1x8xf32>
    %111 = arith.mulf %100, %109 : vector<1x8xf32>
    %112 = arith.subf %110, %111 : vector<1x8xf32>
    %113 = tpu.concatenate %109, %109, %109, %109, %109, %109, %109, %109, %109, %109, %109, %109, %109, %109, %109, %109 in 1 : vector<1x8xf32>, vector<1x8xf32>, vector<1x8xf32>, vector<1x8xf32>, vector<1x8xf32>, vector<1x8xf32>, vector<1x8xf32>, vector<1x8xf32>, vector<1x8xf32>, vector<1x8xf32>, vector<1x8xf32>, vector<1x8xf32>, vector<1x8xf32>, vector<1x8xf32>, vector<1x8xf32>, vector<1x8xf32> -> vector<1x128xf32>
    %114 = tpu.concatenate %112, %112, %112, %112, %112, %112, %112, %112, %112, %112, %112, %112, %112, %112, %112, %112 in 1 : vector<1x8xf32>, vector<1x8xf32>, vector<1x8xf32>, vector<1x8xf32>, vector<1x8xf32>, vector<1x8xf32>, vector<1x8xf32>, vector<1x8xf32>, vector<1x8xf32>, vector<1x8xf32>, vector<1x8xf32>, vector<1x8xf32>, vector<1x8xf32>, vector<1x8xf32>, vector<1x8xf32>, vector<1x8xf32> -> vector<1x128xf32>
    %115 = vector.broadcast %113 : vector<1x128xf32> to vector<32x128xf32>
    %116 = arith.mulf %89, %115 : vector<32x128xf32>
    %117 = vector.broadcast %114 : vector<1x128xf32> to vector<32x128xf32>
    %118 = arith.addf %116, %117 : vector<32x128xf32>
    %cst_83 = arith.constant 2.000000e-01 : f32
    %119 = vector.broadcast %cst_83 : f32 to vector<32x128xf32>
    %120 = arith.mulf %119, %118 : vector<32x128xf32>
    %121 = arith.maximumf %118, %120 : vector<32x128xf32>
    %122 = vector.shape_cast %121 : vector<32x128xf32> to vector<2x8x2x128xf32>
    %123 = vector.extract_strided_slice %122 {offsets = [0, 0, 0, 0], sizes = [2, 8, 1, 128], strides = [1, 1, 1, 1]} : vector<2x8x2x128xf32> to vector<2x8x1x128xf32>
    %124 = vector.shape_cast %123 : vector<2x8x1x128xf32> to vector<2x8x128xf32>
    %125 = vector.extract_strided_slice %122 {offsets = [0, 0, 1, 0], sizes = [2, 8, 1, 128], strides = [1, 1, 1, 1]} : vector<2x8x2x128xf32> to vector<2x8x1x128xf32>
    %126 = vector.shape_cast %125 : vector<2x8x1x128xf32> to vector<2x8x128xf32>
    %127 = arith.maximumf %124, %126 : vector<2x8x128xf32>
    %128 = vector.shape_cast %127 : vector<2x8x128xf32> to vector<16x128xf32>
    %129 = vector.extract_strided_slice %128 {offsets = [0, 0], sizes = [16, 120], strides = [1, 1]} : vector<16x128xf32> to vector<16x120xf32>
    %130 = vector.extract_strided_slice %128 {offsets = [0, 8], sizes = [16, 120], strides = [1, 1]} : vector<16x128xf32> to vector<16x120xf32>
    %131 = arith.maximumf %129, %130 : vector<16x120xf32>
    %c0_84 = arith.constant 0 : index
    %c0_85 = arith.constant 0 : index
    %132 = vector.load %arg9[%c0_84, %c0_85] : memref<120x64xf32, #tpu.memory_space<vmem>>, vector<120x64xf32>
    %cst_86 = arith.constant dense<0.000000e+00> : vector<16x64xf32>
    %133 = tpu.matmul %131, %132, %cst_86 {dimension_numbers = #tpu.dot_dimension_numbers<[1], [0], [0], [1], [0, 0, 1, 1], [], []>} : vector<16x120xf32>, vector<120x64xf32>, vector<16x64xf32> -> vector<16x64xf32>
    %c0_87 = arith.constant 0 : index
    %c0_88 = arith.constant 0 : index
    %134 = vector.load %arg10[%c0_87, %c0_88] : memref<16x64xf32, #tpu.memory_space<vmem>>, vector<16x64xf32>
    tpu.vector_store %arg10[%c0_87, %c0_88], %133 {strides = array<i32>} : memref<16x64xf32, #tpu.memory_space<vmem>>, vector<16x64xf32>,
    return
  }
  func.func @transform_0(%arg0: i32) -> (i32, i32, i32) {
    %c0_i32 = arith.constant 0 : i32
    %c0_i32_0 = arith.constant 0 : i32
    %c0_i32_1 = arith.constant 0 : i32
    %c0_i32_2 = arith.constant 0 : i32
    return %c0_i32, %c0_i32_0, %c0_i32_1 : i32, i32, i32
  }
  func.func @transform_1(%arg0: i32) -> (i32, i32, i32) {
    %c0_i32 = arith.constant 0 : i32
    %c0_i32_0 = arith.constant 0 : i32
    %c0_i32_1 = arith.constant 0 : i32
    %c0_i32_2 = arith.constant 0 : i32
    return %c0_i32, %c0_i32_0, %c0_i32_1 : i32, i32, i32
  }
  func.func @transform_2(%arg0: i32) -> (i32, i32) {
    %c0_i32 = arith.constant 0 : i32
    %c0_i32_0 = arith.constant 0 : i32
    %c0_i32_1 = arith.constant 0 : i32
    return %c0_i32, %c0_i32_0 : i32, i32
  }
  func.func @transform_3(%arg0: i32) -> (i32, i32, i32) {
    %c0_i32 = arith.constant 0 : i32
    %c0_i32_0 = arith.constant 0 : i32
    %c0_i32_1 = arith.constant 0 : i32
    %c0_i32_2 = arith.constant 0 : i32
    return %c0_i32, %c0_i32_0, %c0_i32_1 : i32, i32, i32
  }
  func.func @transform_4(%arg0: i32) -> (i32, i32) {
    %c0_i32 = arith.constant 0 : i32
    %c0_i32_0 = arith.constant 0 : i32
    %c0_i32_1 = arith.constant 0 : i32
    return %c0_i32, %c0_i32_0 : i32, i32
  }
  func.func @transform_5(%arg0: i32) -> (i32, i32) {
    %c0_i32 = arith.constant 0 : i32
    %c0_i32_0 = arith.constant 0 : i32
    %c0_i32_1 = arith.constant 0 : i32
    return %c0_i32, %c0_i32_0 : i32, i32
  }
  func.func @transform_6(%arg0: i32) -> (i32, i32) {
    %c0_i32 = arith.constant 0 : i32
    %c0_i32_0 = arith.constant 0 : i32
    %c0_i32_1 = arith.constant 0 : i32
    return %c0_i32, %c0_i32_0 : i32, i32
  }
  func.func @transform_7(%arg0: i32) -> (i32, i32) {
    %c0_i32 = arith.constant 0 : i32
    %c0_i32_0 = arith.constant 0 : i32
    %c0_i32_1 = arith.constant 0 : i32
    return %c0_i32, %c0_i32_0 : i32, i32
  }
  func.func @transform_8(%arg0: i32) -> (i32, i32) {
    %c0_i32 = arith.constant 0 : i32
    %c0_i32_0 = arith.constant 0 : i32
    %c0_i32_1 = arith.constant 0 : i32
    return %c0_i32, %c0_i32_0 : i32, i32
  }
  func.func @transform_9(%arg0: i32) -> (i32, i32) {
    %c0_i32 = arith.constant 0 : i32
    %c0_i32_0 = arith.constant 0 : i32
    %c0_i32_1 = arith.constant 0 : i32
    return %c0_i32, %c0_i32_0 : i32, i32
  }
}

</mosaic_0001>

<bundles_post_ra>
// kernel: contracting_block_forward.1
= control target key start
LH: loop header
LB: loop body
LE: loop exit
PB: predicated region body
PF: predicated region fallthrough
CT: control target
= control target key end

     0   :  { %vm33_vm0 = vcmask 516096   ;;  %v2627_v1 = vmov 0.0   ;;  %vm42_vm1 = vcmask 523264   ;;  %v2628_v3 = vmov 0.0|0.0   ;;  %s2630_s30 = smov 24   ;;  %s2631_s10 = smov 8   ;;  %s3389_s1 = inlined_call_operand.vmem [shape: bf16[3,64,128], index: 1, kind: input, shape index: {}]   ;;  %s3390_s0 = inlined_call_operand.vmem [shape: f32[2,16,64], index: 0, kind: input, shape index: {}]   ;;  %s3391_s7 = inlined_call_operand.vmem [shape: f32[128,8], index: 7, kind: input, shape index: {}]   ;;  %s3392_s2 = inlined_call_operand.vmem [shape: f32[1,128], index: 2, kind: input, shape index: {}]   ;;  %s3393_s5 = inlined_call_operand.vmem [shape: f32[1,8], index: 5, kind: input, shape index: {}]   ;;  %s3394_s6 = inlined_call_operand.vmem [shape: f32[1,8], index: 6, kind: input, shape index: {}]   ;;  %s3395_s3 = inlined_call_operand.vmem [shape: bf16[3,128,128], index: 3, kind: input, shape index: {}]   ;;  %s3396_s4 = inlined_call_operand.vmem [shape: f32[1,128], index: 4, kind: input, shape index: {}]   ;;  %s3397_s8 = inlined_call_operand.vmem [shape: f32[120,64], index: 8, kind: input, shape index: {}]   ;;  %s3398_s9 = inlined_call_operand.vmem [shape: f32[16,64], index: 9, kind: output, shape index: {}]  }
   0x1   :  { %v2587_v0 = vld [vmem:[%s3389_s1 + $0x20] sm:$0xff]   ;;  %34 = vst.msk [vmem:[#allocation2] sm:$0x1] %vm33_vm0, %v2627_v1  ;;  %36 = vst.msk [vmem:[#allocation2 + $0x11] sm:$0x1] %vm33_vm0, %v2627_v1  ;;  %v2588_v2 = vld [vmem:[%s3389_s1 + $0x28] sm:$0xff]   ;;  %2428 = vmatprep.subr.bf16.mxu1 %v2628_v3 }
   0x2   :  { %35 = vst.msk [vmem:[#allocation2 + $0x18] sm:$0x1] %vm33_vm0, %v2627_v1  ;;  %37 = vst.msk [vmem:[#allocation2 + $0x29] sm:$0x1] %vm33_vm0, %v2627_v1  ;;  %2159 = vmatprep.subr.bf16.mxu0 %v2587_v0  ;;  %v2589_v4 = vld [vmem:[%s3389_s1 + $0x30] sm:$0xff]   ;;  %v38_v5 = vld [vmem:[%s3390_s0] sm:$0xff] }
   0x3   :  { %730 = vst [vmem:[#allocation3] sm:$0x1] %v2627_v1  ;;  %731 = vst [vmem:[#allocation3 + $0x18] sm:$0x1] %v2627_v1  ;;  %2160 = vmatpush3.bf16.msra.mxu0 %v2587_v0  ;;  %v39_v6 = vld [vmem:[%s3390_s0 + $0x8] sm:$0xff]  ;;  %v40_v7 = vld [vmem:[%s3390_s0 + $0x10] sm:$0xff] }
   0x4   :  { %732 = vst [vmem:[#allocation3 + $0x11] sm:$0x1] %v2627_v1  ;;  %733 = vst [vmem:[#allocation3 + $0x29] sm:$0x1] %v2627_v1  ;;  %2161 = vmatprep.subr.bf16.mxu0 %v2588_v2  ;;  %v41_v8 = vld [vmem:[%s3390_s0 + $0x18] sm:$0xff]  ;;  %v2591_v10 = vld [vmem:[%s3389_s1] sm:$0xff]  }
   0x5   :  { %43 = vst.msk [vmem:[#allocation2 + $0x1] sm:$0xff] %vm42_vm1, %v38_v5  ;;  %44 = vst.msk [vmem:[#allocation2 + $0x9] sm:$0xff] %vm42_vm1, %v39_v6  ;;  %v2590_v9 = vld [vmem:[%s3389_s1 + $0x38] sm:$0xff]   ;;  %vm70_vm2 = vcmask 1046528   ;;  %v395_v26 = vld [vmem:[%s3391_s7] sm:$0xff]  ;;  %vm254_vm3 = vcmask 1045504  }
   0x6   :  { %45 = vst.msk [vmem:[#allocation2 + $0x19] sm:$0xff] %vm42_vm1, %v40_v7  ;;  %46 = vst.msk [vmem:[#allocation2 + $0x21] sm:$0xff] %vm42_vm1, %v41_v8  ;;  %v396_v27 = vld [vmem:[%s3391_s7 + $0x8] sm:$0xff]  ;;  %v397_v31 = vld [vmem:[%s3391_s7 + $0x10] sm:$0xff]  ;;  %vm2629_vm4 = vmmov 0   ;;  %s2632_s11 = smov 16  }
   0x7   :  { %2162 = vmatpush3.bf16.msra.mxu0 %v2588_v2  ;;  %v398_v32 = vld [vmem:[%s3391_s7 + $0x18] sm:$0xff]  ;;  %v2592_v34 = vld [vmem:[%s3389_s1 + $0x8] sm:$0xff]   ;;  %v2762_v35 = vpack.c.bf16 %v396_v27, %v395_v26  ;;  %v2593_v37 = vld [vmem:[%s3389_s1 + $0x10] sm:$0xff]   ;;  %2227 = vmatprep.mubr.msk.f32.mxu1 %vm2629_vm4, %v2627_v1  ;;  %s2633_s12 = smov 32   ;;  %s2634_s13 = smov 40   ;;  %vm612_vm5 = vcmask 64512  }
   0x8   :  { %2163 = vmatprep.subr.bf16.mxu0 %v2589_v4  ;;  %v2766_v36 = vpack.c.bf16 %v398_v32, %v397_v31  ;;  %v2594_v41 = vld [vmem:[%s3389_s1 + $0x18] sm:$0xff]   ;;  %v2595_v42 = vld [vmem:[%s3389_s1 + $0x40] sm:$0xff]   ;;  %v2596_v47 = vld [vmem:[%s3389_s1 + $0x48] sm:$0xff]   ;;  %s2635_s14 = smov 48   ;;  %s2636_s15 = smov 56   ;;  %vm614_vm6 = vcmask 130048  }
   0x9   :  { %2430 = vmatpush3.bf16.msra.mxu1 %v2762_v35  ;;  %v2597_v48 = vld [vmem:[%s3389_s1 + $0x50] sm:$0xff]   ;;  %v2598_v52 = vld [vmem:[%s3389_s1 + $0x58] sm:$0xff]   ;;  %v399_v56 = vld [vmem:[%s3391_s7 + $0x20] sm:$0xff]  ;;  %s2637_s16 = smov 64   ;;  %s2638_s17 = smov 72   ;;  %vm3399_vm7 = vcmask 195584  }
   0xa   :  { %2431 = vmatprep.subr.bf16.mxu1 %v2628_v3  ;;  %v400_v57 = vld [vmem:[%s3391_s7 + $0x28] sm:$0xff]  ;;  %v401_v59 = vld [vmem:[%s3391_s7 + $0x30] sm:$0xff]  ;;  %v402_v60 = vld [vmem:[%s3391_s7 + $0x38] sm:$0xff]  ;;  %s2639_s18 = smov 80   ;;  %s2640_s23 = smov 88   ;;  %vm3400_vm8 = vcmask 261120  }
   0xb   :  { %2164 = vmatpush3.bf16.msra.mxu0 %v2589_v4  ;;  %v2807_v58 = vpack.c.bf16 %v400_v57, %v399_v56  ;;  %v2817_v61 = vpack.c.bf16 %v402_v60, %v401_v59  ;;  %v403_v62 = vld [vmem:[%s3391_s7 + $0x40] sm:$0xff]  ;;  %v404_v63 = vld [vmem:[%s3391_s7 + $0x48] sm:$0xff]  ;;  %v405_v2 = vld [vmem:[%s3391_s7 + $0x50] sm:$0xff]  ;;  %s2641_s24 = smov 96   ;;  %s2642_s0 = smov 104   ;;  %vm620_vm9 = vcmask 326656  }
   0xc   :  { %2165 = vmatprep.subr.bf16.mxu0 %v2590_v9  ;;  %v48_v11 = vld [vmem:[#allocation2] sm:$0xff]  ;;  %v49_v12 = vld [vmem:[#allocation2 + $0x8] sm:$0xff]  ;;  %v50_v13 = vld [vmem:[#allocation2 + $0x10] sm:$0x3]  ;;  %v2827_v0 = vpack.c.bf16 %v404_v63, %v403_v62  ;;  %s2644_s1 = smov 120   ;;  %vm622_vm10 = vcmask 392192  }
   0xd   :  { %v71_v14 = vrot.slane %v48_v11, 1  ;;  %v72_v15 = vrot.slane %v49_v12, 1  ;;  %v74_v16 = vrot.slane %v50_v13, 1  ;;  %v2736_v17 = vld [vmem:[#allocation2 + $0x18] sm:$0xff]  ;;  %v2738_v18 = vld [vmem:[#allocation2 + $0x20] sm:$0xff]  ;;  %v54_v30 = vpack.c.bf16 %v49_v12, %v48_v11  ;;  %2433 = vmatpush3.bf16.msra.mxu1 %v2766_v36  ;;  %v408_v7 = vld [vmem:[%s3391_s7 + $0x68] sm:$0xff] }
   0xe   :  { %v53_v19 = vld [vmem:[#allocation2 + $0x28] sm:$0x3]  ;;  %v76_v20 = vrot.slane %v2736_v17, 1  ;;  %v77_v23 = vrot.slane %v2738_v18, 1  ;;  %2434 = vmatprep.subr.bf16.mxu1 %v2628_v3  ;;  %v255_v38 = vrot.slane %v48_v11, 2  ;;  %v256_v39 = vrot.slane %v49_v12, 2 }
   0xf   :  { %2166 = vmatpush3.bf16.msra.mxu0 %v2590_v9  ;;  %v73_v21 = vsel %vm70_vm2, %v71_v14, %v72_v15  ;;  %v75_v22 = vsel %vm70_vm2, %v72_v15, %v74_v16  ;;  %v79_v24 = vrot.slane %v53_v19, 1  ;;  %v258_v40 = vrot.slane %v50_v13, 2  ;;  %v406_v4 = vld [vmem:[%s3391_s7 + $0x58] sm:$0xff]  ;;  %v407_v6 = vld [vmem:[%s3391_s7 + $0x60] sm:$0xff]  ;;  %v409_v9 = vld [vmem:[%s3391_s7 + $0x70] sm:$0xff] }
  0x10   :  { %v85_v25 = vpack.c.bf16 %v75_v22, %v73_v21  ;;  %2171 = vmatprep.subr.bf16.mxu0 %v2591_v10  ;;  %v78_v28 = vsel %vm70_vm2, %v76_v20, %v77_v23  ;;  %v257_v43 = vsel %vm254_vm3, %v255_v38, %v256_v39  ;;  %v55_v45 = vpack.c.bf16 %v2738_v18, %v2736_v17  ;;  %v1950_v13 = vld [vmem:[%s3392_s2] ss:$0 sm:$0xff]  ;;  %s2643_s2 = smov 112  }
  0x11   :  { %v80_v29 = vsel %vm70_vm2, %v77_v23, %v79_v24  ;;  %v259_v44 = vsel %vm254_vm3, %v256_v39, %v258_v40  ;;  %v263_v49 = vrot.slane %v53_v19, 2  ;;  %v260_v50 = vrot.slane %v2736_v17, 2  ;;  %2436 = vmatpush3.bf16.msra.mxu1 %v2807_v58  ;;  %v555_v56 = vld [vmem:[%s3393_s5] sm:$0x1] }
  0x12   :  { %2167 = vmatprep.mubr.msk.bf16.mxu0 %vm42_vm1, %v85_v25  ;;  %v86_v33 = vpack.c.bf16 %v80_v29, %v78_v28  ;;  %v269_v46 = vpack.c.bf16 %v259_v44, %v257_v43  ;;  %v261_v51 = vrot.slane %v2738_v18, 2  ;;  %2437 = vmatprep.subr.bf16.mxu1 %v2628_v3  ;;  %v2837_v5 = vpack.c.bf16 %v406_v4, %v405_v2  ;;  %v559_v62 = vld [vmem:[%s3394_s6] sm:$0x1] }
  0x13   :  { %v2847_v8 = vpack.c.bf16 %v408_v7, %v407_v6  ;;  %v2599_v7 = vld [vmem:[%s3395_s3 + $0x40] sm:$0xff]   ;;  %vm624_vm11 = vcmask 457728   ;;  %vm627_vm12 = vcmask 588800   ;;  %vm629_vm13 = vcmask 654336  }
  0x14   :  { %2168 = vmatmul.mubr.msk.bf16.vlgmr.msra.gmra.mrb[0].mxu0 %vm42_vm1, %v86_v33  ;;  %v262_v53 = vsel %vm254_vm3, %v260_v50, %v261_v51  ;;  %v264_v54 = vsel %vm254_vm3, %v261_v51, %v263_v49  ;;  %vm631_vm14 = vcmask 719872   ;;  %vm633_vm15 = vcmask 785408  }
  0x15   :  { %2172 = vmatpush3.bf16.msra.mxu0 %v2591_v10  ;;  %2179 = vmatprep.mubr.msk.bf16.mxu0 %vm42_vm1, %v54_v30  ;;  %v270_v55 = vpack.c.bf16 %v264_v54, %v262_v53  ;;  %v410_v10 = vld [vmem:[%s3391_s7 + $0x78] sm:$0xff]  ;;  %v563_v54 = vlaneseq  ;;  %vm635_vm0 = vcmask 850944  }
  0x16   :  { %2173 = vmatprep.subr.bf16.mxu0 %v2592_v34  ;;  %2439 = vmatpush3.bf16.msra.mxu1 %v2817_v61  ;;  %v2858_v11 = vpack.c.bf16 %v410_v10, %v409_v9  ;;  %v2600_v9 = vld [vmem:[%s3395_s3 + $0x48] sm:$0xff]   ;;  %v2601_v10 = vld [vmem:[%s3395_s3 + $0x50] sm:$0xff]  }
  0x17   :  { %2440 = vmatprep.subr.bf16.mxu1 %v2628_v3 }
  0x19   :  { %2174 = vmatpush3.bf16.msra.mxu0 %v2592_v34 }
  0x1a   :  { %2175 = vmatprep.subr.bf16.mxu0 %v2593_v37  ;;  %2442 = vmatpush3.bf16.msra.mxu1 %v2827_v0 }
  0x1b   :  { %2443 = vmatprep.subr.bf16.mxu1 %v2628_v3 }
  0x1d   :  { %2176 = vmatpush3.bf16.msra.mxu0 %v2593_v37 }
  0x1e   :  { %2177 = vmatprep.subr.bf16.mxu0 %v2594_v41  ;;  %2445 = vmatpush3.bf16.msra.mxu1 %v2837_v5 }
  0x1f   :  { %2446 = vmatprep.subr.bf16.mxu1 %v2628_v3 }
  0x21   :  { %2178 = vmatpush3.bf16.msra.mxu0 %v2594_v41 }
  0x22   :  { %2183 = vmatprep.subr.bf16.mxu0 %v2595_v42  ;;  %2448 = vmatpush3.bf16.msra.mxu1 %v2847_v8 }
  0x23   :  { %2449 = vmatprep.subr.bf16.mxu1 %v2628_v3 }
  0x24   :  { %2180 = vmatmul.mubr.msk.bf16.vlgmr.msra.gmra.mrb[0].mxu0 %vm42_vm1, %v55_v45 }
  0x25   :  { %2184 = vmatpush3.bf16.msra.mxu0 %v2595_v42  ;;  %2191 = vmatprep.mubr.msk.bf16.mxu0 %vm42_vm1, %v269_v46 }
  0x26   :  { %2185 = vmatprep.subr.bf16.mxu0 %v2596_v47  ;;  %2451 = vmatpush3.bf16.msra.mxu1 %v2858_v11 }
  0x27   :  { %2452 = vmatprep.subr.bf16.mxu1 %v2628_v3 }
  0x29   :  { %2186 = vmatpush3.bf16.msra.mxu0 %v2596_v47 }
  0x2a   :  { %2187 = vmatprep.subr.bf16.mxu0 %v2597_v48 }
  0x2d   :  { %2188 = vmatpush3.bf16.msra.mxu0 %v2597_v48 }
  0x2e   :  { %2189 = vmatprep.subr.bf16.mxu0 %v2598_v52 }
  0x31   :  { %2190 = vmatpush3.bf16.msra.mxu0 %v2598_v52 }
  0x32   :  { %2265 = vmatprep.subr.bf16.mxu0 %v2599_v7 }
  0x34   :  { %2192 = vmatmul.mubr.msk.bf16.vlgmr.msra.gmra.mrb[0].mxu0 %vm42_vm1, %v270_v55  ;;  %v2922_v55 = vshrl.u32 %v563_v54, 7 }
  0x35   :  { %2266 = vmatpush3.bf16.msra.mxu0 %v2599_v7 }
  0x36   :  { %v2928_v57 = vsub.s32 0, %v2922_v55  ;;  %2267 = vmatprep.subr.bf16.mxu0 %v2600_v9 }
  0x39   :  { %2268 = vmatpush3.bf16.msra.mxu0 %v2600_v9 }
  0x3a   :  { %2269 = vmatprep.subr.bf16.mxu0 %v2601_v10 }
  0x3d   :  { %2270 = vmatpush3.bf16.msra.mxu0 %v2601_v10 }
 0x107   :  { %v2193_v12 = vpop.f32.mrb[0].mxu0 }
 0x108   :  { %v344_v14 = vpop.f32.mrb[1].mxu0  ;;  %v2870_v19 = vadd.f32 %v2193_v12, %v1950_v13  ;;  %v2602_v12 = vld [vmem:[%s3395_s3 + $0x58] sm:$0xff]  }
 0x109   :  { %v2194_v15 = vpop.f32.mrb[2].mxu0  ;;  %v2866_v17 = vadd.f32 %v1950_v13, %v344_v14  ;;  %2271 = vmatprep.subr.bf16.mxu0 %v2602_v12  ;;  %v2604_v14 = vld [vmem:[%s3395_s3 + $0x68] sm:$0xff]  }
 0x10a   :  { %v347_v16 = vpop.f32.mrb[3].mxu0  ;;  %v2874_v21 = vadd.f32 %v2194_v15, %v1950_v13  ;;  %v384_v33 = vmul.f32 %v2870_v19, %v2870_v19  ;;  %2272 = vmatpush3.bf16.msra.mxu0 %v2602_v12  ;;  %v2605_v15 = vld [vmem:[%s3395_s3 + $0x70] sm:$0xff]  }
 0x10b   :  { %v2868_v18 = vadd.f32 %v1950_v13, %v347_v16  ;;  %v382_v29 = vmul.f32 %v2866_v17, %v2866_v17  ;;  %v2603_v13 = vld [vmem:[%s3395_s3 + $0x60] sm:$0xff]   ;;  %v2606_v16 = vld [vmem:[%s3395_s3 + $0x78] sm:$0xff]  }
 0x10c   :  { %v385_v37 = vmul.f32 %v2874_v21, %v2874_v21  ;;  %2273 = vmatprep.subr.bf16.mxu0 %v2603_v13 }
 0x10d   :  { %v373_v20 = vadd.f32 %v2868_v18, %v2866_v17  ;;  %v383_v27 = vmul.f32 %v2868_v18, %v2868_v18 }
 0x10e   :  { %2274 = vmatpush3.bf16.msra.mxu0 %v2603_v13 }
 0x10f   :  { %v374_v22 = vadd.f32 %v373_v20, %v2870_v19  ;;  %v386_v31 = vadd.f32 %v383_v27, %v382_v29  ;;  %2275 = vmatprep.subr.bf16.mxu0 %v2604_v14  ;;  %v2999_v20 = vld [vmem:[%s3395_s3] sm:$0xff]  }
 0x111   :  { %v375_v23 = vadd.f32 %v374_v22, %v2874_v21  ;;  %v387_v34 = vadd.f32 %v386_v31, %v384_v33 }
 0x112   :  { %2276 = vmatpush3.bf16.msra.mxu0 %v2604_v14 }
 0x113   :  { %v376_v24 = vrot.slane %v375_v23, 4  ;;  %v388_v38 = vadd.f32 %v387_v34, %v385_v37  ;;  %2277 = vmatprep.subr.bf16.mxu0 %v2605_v15 }
 0x115   :  { %v377_v25 = vadd.f32 %v376_v24, %v375_v23  ;;  %v389_v39 = vrot.slane %v388_v38, 4 }
 0x116   :  { %2278 = vmatpush3.bf16.msra.mxu0 %v2605_v15 }
 0x117   :  { %v378_v26 = vrot.slane %v377_v25, 2  ;;  %v390_v40 = vadd.f32 %v389_v39, %v388_v38  ;;  %2279 = vmatprep.subr.bf16.mxu0 %v2606_v16 }
 0x119   :  { %v379_v28 = vadd.f32 %v378_v26, %v377_v25  ;;  %v391_v41 = vrot.slane %v390_v40, 2 }
 0x11a   :  { %2280 = vmatpush3.bf16.msra.mxu0 %v2606_v16 }
 0x11b   :  { %v380_v30 = vrot.slane %v379_v28, 1  ;;  %v392_v42 = vadd.f32 %v391_v41, %v390_v40  ;;  %2285 = vmatprep.subr.bf16.mxu0 %v2999_v20 }
 0x11d   :  { %v381_v32 = vadd.f32 %v380_v30, %v379_v28  ;;  %v393_v43 = vrot.slane %v392_v42, 1 }
 0x11f   :  { %2228 = vmatmul.mubr.f32.vlgmr.msra.gmra.mrb[0].mxu1 %v381_v32  ;;  %v394_v44 = vadd.f32 %v393_v43, %v392_v42 }
 0x120   :  { %2454 = vmatpush3.bf16.msra.mxu1 %v2762_v35  ;;  %2262 = vmatprep.mubr.msk.f32.mxu1 %vm2629_vm4, %v2627_v1 }
 0x121   :  { %2455 = vmatprep.subr.bf16.mxu1 %v2628_v3 }
 0x124   :  { %2457 = vmatpush3.bf16.msra.mxu1 %v2766_v36 }
 0x125   :  { %2458 = vmatprep.subr.bf16.mxu1 %v2628_v3 }
 0x128   :  { %2460 = vmatpush3.bf16.msra.mxu1 %v2807_v58 }
 0x129   :  { %2461 = vmatprep.subr.bf16.mxu1 %v2628_v3 }
 0x12c   :  { %2463 = vmatpush3.bf16.msra.mxu1 %v2817_v61 }
 0x12d   :  { %2464 = vmatprep.subr.bf16.mxu1 %v2628_v3 }
 0x130   :  { %2466 = vmatpush3.bf16.msra.mxu1 %v2827_v0 }
 0x131   :  { %2467 = vmatprep.subr.bf16.mxu1 %v2628_v3 }
 0x134   :  { %2469 = vmatpush3.bf16.msra.mxu1 %v2837_v5 }
 0x135   :  { %2470 = vmatprep.subr.bf16.mxu1 %v2628_v3 }
 0x138   :  { %2472 = vmatpush3.bf16.msra.mxu1 %v2847_v8 }
 0x139   :  { %2473 = vmatprep.subr.bf16.mxu1 %v2628_v3 }
 0x13c   :  { %2475 = vmatpush3.bf16.msra.mxu1 %v2858_v11 }
 0x13d   :  { %2476 = vmatprep.subr.bf16.mxu1 %v2628_v3 }
 0x13f   :  { %2263 = vmatmul.mubr.f32.vlgmr.msra.gmra.mrb[2].mxu1 %v394_v44 }
 0x140   :  { %2478 = vmatpush3.bf16.msra.mxu1 %v2762_v35  ;;  %2357 = vmatprep.mubr.msk.f32.mxu1 %vm2629_vm4, %v2627_v1 }
 0x141   :  { %2479 = vmatprep.subr.bf16.mxu1 %v2628_v3 }
 0x144   :  { %2481 = vmatpush3.bf16.msra.mxu1 %v2766_v36 }
 0x145   :  { %2482 = vmatprep.subr.bf16.mxu1 %v2628_v3 }
 0x148   :  { %2484 = vmatpush3.bf16.msra.mxu1 %v2807_v58 }
 0x149   :  { %2485 = vmatprep.subr.bf16.mxu1 %v2628_v3 }
 0x14c   :  { %2487 = vmatpush3.bf16.msra.mxu1 %v2817_v61 }
 0x14d   :  { %2488 = vmatprep.subr.bf16.mxu1 %v2628_v3 }
 0x150   :  { %2490 = vmatpush3.bf16.msra.mxu1 %v2827_v0 }
 0x151   :  { %2491 = vmatprep.subr.bf16.mxu1 %v2628_v3 }
 0x154   :  { %2493 = vmatpush3.bf16.msra.mxu1 %v2837_v5 }
 0x155   :  { %2494 = vmatprep.subr.bf16.mxu1 %v2628_v3 }
 0x158   :  { %2496 = vmatpush3.bf16.msra.mxu1 %v2847_v8 }
 0x159   :  { %2497 = vmatprep.subr.bf16.mxu1 %v2628_v3 }
 0x15c   :  { %2499 = vmatpush3.bf16.msra.mxu1 %v2858_v11 }
 0x15d   :  { %2500 = vmatprep.subr.bf16.mxu1 %v2628_v3 }
 0x1f2   :  { %v477_v45 = vpop.f32.mrb[0].mxu1 }
 0x1f3   :  { %v2229_v46 = vpop.f32.mrb[1].mxu1  ;;  %v551_v47 = vmul.f32 0.001953125, %v477_v45 }
 0x1f5   :  { %v553_v49 = vmul.f32 %v551_v47, %v551_v47 }
 0x212   :  { %v547_v48 = vpop.f32.mrb[2].mxu1 }
 0x213   :  { %v552_v50 = vmul.f32 0.001953125, %v547_v48  ;;  %v2264_v51 = vpop.f32.mrb[3].mxu1 }
 0x215   :  { %v554_v52 = vsub.f32 %v552_v50, %v553_v49 }
 0x217   :  { %v556_v53 = vadd.f32 1e-05, %v554_v52 }
 0x219   :  { %2623 = vrsqrt.f32 %v556_v53 }
 0x223   :  { %v2624_v59 = vpop.eup %2623 }
 0x224   :  { %v2930_v60 = vmul.f32 %v2624_v59, %v555_v56 }
 0x226   :  { %v560_v63 = vmul.f32 %v2930_v60, %v551_v47  ;;  %v566_v2 = vrot.slane %v2930_v60, %v2928_v57 }
 0x228   :  { %v2938_v4 = vsub.f32 %v559_v62, %v560_v63  ;;  %573 = vrot.lane.b32.xlu1 %v566_v2, %s2630_s30  ;;  %567 = vrot.lane.b32.xlu0 %v566_v2, %s2631_s10 }
 0x22a   :  { %v645_v6 = vrot.slane %v2938_v4, %v2928_v57 }
 0x22c   :  { %570 = vrot.lane.b32.xlu0 %v566_v2, %s2632_s11  ;;  %646 = vrot.lane.b32.xlu1 %v645_v6, %s2631_s10 }
 0x230   :  { %576 = vrot.lane.b32.xlu0 %v566_v2, %s2633_s12  ;;  %649 = vrot.lane.b32.xlu1 %v645_v6, %s2632_s11 }
 0x234   :  { %579 = vrot.lane.b32.xlu0 %v566_v2, %s2634_s13  ;;  %652 = vrot.lane.b32.xlu1 %v645_v6, %s2630_s30 }
 0x238   :  { %582 = vrot.lane.b32.xlu0 %v566_v2, %s2635_s14  ;;  %655 = vrot.lane.b32.xlu1 %v645_v6, %s2633_s12 }
 0x23c   :  { %585 = vrot.lane.b32.xlu0 %v566_v2, %s2636_s15  ;;  %658 = vrot.lane.b32.xlu1 %v645_v6, %s2634_s13 }
 0x240   :  { %588 = vrot.lane.b32.xlu0 %v566_v2, %s2637_s16  ;;  %661 = vrot.lane.b32.xlu1 %v645_v6, %s2635_s14 }
 0x244   :  { %591 = vrot.lane.b32.xlu0 %v566_v2, %s2638_s17  ;;  %664 = vrot.lane.b32.xlu1 %v645_v6, %s2636_s15 }
 0x248   :  { %594 = vrot.lane.b32.xlu0 %v566_v2, %s2639_s18  ;;  %667 = vrot.lane.b32.xlu1 %v645_v6, %s2637_s16 }
 0x24c   :  { %597 = vrot.lane.b32.xlu0 %v566_v2, %s2640_s23  ;;  %670 = vrot.lane.b32.xlu1 %v645_v6, %s2638_s17 }
 0x250   :  { %600 = vrot.lane.b32.xlu0 %v566_v2, %s2641_s24  ;;  %673 = vrot.lane.b32.xlu1 %v645_v6, %s2639_s18 }
 0x254   :  { %603 = vrot.lane.b32.xlu0 %v566_v2, %s2642_s0  ;;  %676 = vrot.lane.b32.xlu1 %v645_v6, %s2640_s23 }
 0x258   :  { %606 = vrot.lane.b32.xlu0 %v566_v2, %s2643_s2  ;;  %679 = vrot.lane.b32.xlu1 %v645_v6, %s2641_s24 }
 0x25c   :  { %609 = vrot.lane.b32.xlu0 %v566_v2, %s2644_s1  ;;  %682 = vrot.lane.b32.xlu1 %v645_v6, %s2642_s0 }
 0x260   :  { %685 = vrot.lane.b32.xlu0 %v645_v6, %s2643_s2  ;;  %688 = vrot.lane.b32.xlu1 %v645_v6, %s2644_s1 }
 0x29a   :  { %v574_v22 = vpop.permute.xlu1 %573  ;;  %v568_v23 = vpop.permute.xlu0 %567 }
 0x29b   :  { %v613_v44 = vsel %vm612_vm5, %v2930_v60, %v568_v23 }
 0x29e   :  { %v571_v24 = vpop.permute.xlu0 %570  ;;  %v647_v25 = vpop.permute.xlu1 %646 }
 0x29f   :  { %v615_v45 = vsel %vm614_vm6, %v613_v44, %v571_v24  ;;  %v691_v51 = vsel %vm612_vm5, %v2938_v4, %v647_v25 }
 0x2a0   :  { %v617_v48 = vsel %vm3399_vm7, %v615_v45, %v574_v22 }
 0x2a2   :  { %v577_v26 = vpop.permute.xlu0 %576  ;;  %v650_v27 = vpop.permute.xlu1 %649 }
 0x2a3   :  { %v619_v49 = vsel %vm3400_vm8, %v617_v48, %v577_v26  ;;  %v692_v56 = vsel %vm614_vm6, %v691_v51, %v650_v27 }
 0x2a6   :  { %v580_v28 = vpop.permute.xlu0 %579  ;;  %v653_v29 = vpop.permute.xlu1 %652 }
 0x2a7   :  { %v621_v50 = vsel %vm620_vm9, %v619_v49, %v580_v28  ;;  %v693_v60 = vsel %vm3399_vm7, %v692_v56, %v653_v29  ;;  %vm637_vm7 = vcmask 916480  }
 0x2aa   :  { %v583_v30 = vpop.permute.xlu0 %582  ;;  %v656_v31 = vpop.permute.xlu1 %655 }
 0x2ab   :  { %v623_v52 = vsel %vm622_vm10, %v621_v50, %v583_v30  ;;  %v694_v63 = vsel %vm3400_vm8, %v693_v60, %v656_v31  ;;  %vm3401_vm8 = vcmask 982016  }
 0x2ae   :  { %v586_v32 = vpop.permute.xlu0 %585  ;;  %v659_v33 = vpop.permute.xlu1 %658 }
 0x2af   :  { %v625_v59 = vsel %vm624_vm11, %v623_v52, %v586_v32  ;;  %v695_v4 = vsel %vm620_vm9, %v694_v63, %v659_v33 }
 0x2b2   :  { %v589_v34 = vpop.permute.xlu0 %588  ;;  %v662_v37 = vpop.permute.xlu1 %661 }
 0x2b3   :  { %v626_v62 = vsel %vm42_vm1, %v625_v59, %v589_v34  ;;  %v696_v10 = vsel %vm622_vm10, %v695_v4, %v662_v37 }
 0x2b6   :  { %v592_v38 = vpop.permute.xlu0 %591  ;;  %v665_v39 = vpop.permute.xlu1 %664 }
 0x2b7   :  { %v628_v2 = vsel %vm627_vm12, %v626_v62, %v592_v38  ;;  %v697_v13 = vsel %vm624_vm11, %v696_v10, %v665_v39 }
 0x2ba   :  { %v595_v40 = vpop.permute.xlu0 %594  ;;  %v668_v41 = vpop.permute.xlu1 %667 }
 0x2bb   :  { %v630_v6 = vsel %vm629_vm13, %v628_v2, %v595_v40  ;;  %v698_v15 = vsel %vm42_vm1, %v697_v13, %v668_v41 }
 0x2be   :  { %v598_v42 = vpop.permute.xlu0 %597  ;;  %v671_v43 = vpop.permute.xlu1 %670 }
 0x2bf   :  { %v632_v12 = vsel %vm631_vm14, %v630_v6, %v598_v42  ;;  %v699_v22 = vsel %vm627_vm12, %v698_v15, %v671_v43 }
 0x2c2   :  { %v601_v46 = vpop.permute.xlu0 %600  ;;  %v674_v47 = vpop.permute.xlu1 %673 }
 0x2c3   :  { %v634_v14 = vsel %vm633_vm15, %v632_v12, %v601_v46  ;;  %v700_v26 = vsel %vm629_vm13, %v699_v22, %v674_v47 }
 0x2c6   :  { %v604_v53 = vpop.permute.xlu0 %603  ;;  %v677_v54 = vpop.permute.xlu1 %676 }
 0x2c7   :  { %v636_v16 = vsel %vm635_vm0, %v634_v14, %v604_v53  ;;  %v701_v28 = vsel %vm631_vm14, %v700_v26, %v677_v54 }
 0x2ca   :  { %v607_v7 = vpop.permute.xlu0 %606  ;;  %v680_v9 = vpop.permute.xlu1 %679 }
 0x2cb   :  { %v638_v23 = vsel %vm637_vm7, %v636_v16, %v607_v7  ;;  %v702_v30 = vsel %vm633_vm15, %v701_v28, %v680_v9  ;;  %v2609_v28 = vld [vmem:[%s3395_s3 + $0x10] sm:$0xff]  }
 0x2ce   :  { %v610_v24 = vpop.permute.xlu0 %609  ;;  %v683_v25 = vpop.permute.xlu1 %682 }
 0x2cf   :  { %v640_v27 = vsel %vm3401_vm8, %v638_v23, %v610_v24  ;;  %v703_v31 = vsel %vm635_vm0, %v702_v30, %v683_v25  ;;  %v2608_v23 = vld [vmem:[%s3395_s3 + $0x8] sm:$0xff]   ;;  %v2611_v30 = vld [vmem:[%s3395_s3 + $0x20] sm:$0xff]  }
 0x2d0   :  { %v709_v29 = vrot.slane %v640_v27, %v2928_v57 }
 0x2d2   :  { %v686_v32 = vpop.permute.xlu0 %685  ;;  %v689_v33 = vpop.permute.xlu1 %688  ;;  %v710_v37 = vmul.f32 %v709_v29, %v2866_v17  ;;  %v711_v39 = vmul.f32 %v709_v29, %v2868_v18  ;;  %v712_v40 = vmul.f32 %v709_v29, %v2870_v19  ;;  %v713_v41 = vmul.f32 %v709_v29, %v2874_v21  ;;  %v2610_v29 = vld [vmem:[%s3395_s3 + $0x18] sm:$0xff]  }
 0x2d3   :  { %v704_v34 = vsel %vm637_vm7, %v703_v31, %v686_v32  ;;  %v2613_v31 = vld [vmem:[%s3395_s3 + $0x30] sm:$0xff]   ;;  %v2614_v32 = vld [vmem:[%s3395_s3 + $0x38] sm:$0xff]  }
 0x2d4   :  { %v705_v38 = vsel %vm3401_vm8, %v704_v34, %v689_v33 }
 0x2d5   :  { %v717_v42 = vrot.slane %v705_v38, %v2928_v57  ;;  %v2615_v38 = vld [vmem:[%s3395_s3 + $0x80] sm:$0xff]  }
 0x2d7   :  { %v718_v43 = vadd.f32 %v717_v42, %v710_v37  ;;  %v719_v44 = vadd.f32 %v717_v42, %v711_v39  ;;  %v720_v45 = vadd.f32 %v717_v42, %v712_v40  ;;  %v721_v46 = vadd.f32 %v717_v42, %v713_v41  ;;  %v2616_v42 = vld [vmem:[%s3395_s3 + $0x88] sm:$0xff]  }
 0x2d9   :  { %v722_v47 = vmul.f32 0.2, %v718_v43  ;;  %v723_v48 = vmul.f32 0.2, %v719_v44  ;;  %v724_v49 = vmul.f32 0.2, %v720_v45 }
 0x2da   :  { %v725_v50 = vmul.f32 0.2, %v721_v46 }
 0x2db   :  { %v726_v51 = vmax.f32 %v718_v43, %v722_v47  ;;  %v727_v17 = vmax.f32 %v719_v44, %v723_v48  ;;  %v728_v52 = vmax.f32 %v720_v45, %v724_v49  ;;  %v2617_v44 = vld [vmem:[%s3395_s3 + $0x90] sm:$0xff]   ;;  %v2618_v45 = vld [vmem:[%s3395_s3 + $0x98] sm:$0xff]   ;;  %v2620_v47 = vld [vmem:[%s3395_s3 + $0xa8] sm:$0xff]  }
 0x2dc   :  { %v729_v53 = vmax.f32 %v721_v46, %v725_v50  ;;  %v2619_v46 = vld [vmem:[%s3395_s3 + $0xa0] sm:$0xff]   ;;  %v2621_v48 = vld [vmem:[%s3395_s3 + $0xb0] sm:$0xff]   ;;  %v2622_v49 = vld [vmem:[%s3395_s3 + $0xb8] sm:$0xff]  }
 0x2dd   :  { %734 = vst [vmem:[#allocation3 + $0x1] sm:$0xff] %v726_v51  ;;  %735 = vst [vmem:[#allocation3 + $0x9] sm:$0xff] %v727_v17  ;;  %v2007_v51 = vld [vmem:[%s3396_s4] ss:$0 sm:$0xff] }
 0x2de   :  { %736 = vst [vmem:[#allocation3 + $0x19] sm:$0xff] %v728_v52  ;;  %737 = vst [vmem:[#allocation3 + $0x21] sm:$0xff] %v729_v53 }
 0x2e4   :  { %v739_v18 = vld [vmem:[#allocation3] sm:$0xff]  ;;  %v740_v19 = vld [vmem:[#allocation3 + $0x8] sm:$0xff]  ;;  %v741_v21 = vld [vmem:[#allocation3 + $0x10] sm:$0x3] }
 0x2e5   :  { %v769_v54 = vrot.slane %v739_v18, 1  ;;  %v770_v56 = vrot.slane %v740_v19, 1  ;;  %v772_v59 = vrot.slane %v741_v21, 1  ;;  %v742_v60 = vld [vmem:[#allocation3 + $0x18] sm:$0xff]  ;;  %v743_v62 = vld [vmem:[#allocation3 + $0x20] sm:$0xff]  ;;  %v745_v24 = vpack.c.bf16 %v740_v19, %v739_v18 }
 0x2e6   :  { %v744_v63 = vld [vmem:[#allocation3 + $0x28] sm:$0x3]  ;;  %v774_v2 = vrot.slane %v742_v60, 1  ;;  %v775_v4 = vrot.slane %v743_v62, 1  ;;  %v1001_v13 = vrot.slane %v742_v60, 2  ;;  %v1002_v15 = vrot.slane %v743_v62, 2 }
 0x2e7   :  { %v771_v6 = vsel %vm70_vm2, %v769_v54, %v770_v56  ;;  %v773_v7 = vsel %vm70_vm2, %v770_v56, %v772_v59  ;;  %v777_v9 = vrot.slane %v744_v63, 1  ;;  %v1004_v16 = vrot.slane %v744_v63, 2 }
 0x2e8   :  { %v783_v10 = vpack.c.bf16 %v773_v7, %v771_v6  ;;  %v776_v12 = vsel %vm70_vm2, %v774_v2, %v775_v4  ;;  %v1003_v25 = vsel %vm254_vm3, %v1001_v13, %v1002_v15  ;;  %v996_v33 = vrot.slane %v739_v18, 2 }
 0x2e9   :  { %v778_v14 = vsel %vm70_vm2, %v775_v4, %v777_v9  ;;  %v1005_v26 = vsel %vm254_vm3, %v1002_v15, %v1004_v16  ;;  %v997_v34 = vrot.slane %v740_v19, 2  ;;  %v999_v37 = vrot.slane %v741_v21, 2 }
 0x2ea   :  { %2281 = vmatprep.mubr.bf16.mxu0 %v783_v10  ;;  %v784_v22 = vpack.c.bf16 %v778_v14, %v776_v12  ;;  %v1011_v27 = vpack.c.bf16 %v1005_v26, %v1003_v25  ;;  %v746_v41 = vpack.c.bf16 %v743_v62, %v742_v60  ;;  %vm3402_vm2 = vcmask 195584  }
 0x2eb   :  { %v998_v39 = vsel %vm254_vm3, %v996_v33, %v997_v34  ;;  %v1000_v40 = vsel %vm254_vm3, %v997_v34, %v999_v37  ;;  %vm3403_vm3 = vcmask 261120  }
 0x2ec   :  { %2282 = vmatmul.mubr.bf16.vlgmr.msra.gmra.mrb[4].mxu0 %v784_v22  ;;  %v1010_v43 = vpack.c.bf16 %v1000_v40, %v998_v39  ;;  %vm3405_vm8 = vmmov %vm3403_vm3 }
 0x2ed   :  { %2286 = vmatpush3.bf16.msra.mxu0 %v2999_v20  ;;  %2301 = vmatprep.mubr.bf16.mxu0 %v745_v24  ;;  %v2612_v20 = vld [vmem:[%s3395_s3 + $0x28] sm:$0xff]  }
 0x2ee   :  { %2287 = vmatprep.subr.bf16.mxu0 %v2608_v23 }
 0x2f1   :  { %2288 = vmatpush3.bf16.msra.mxu0 %v2608_v23 }
 0x2f2   :  { %2289 = vmatprep.subr.bf16.mxu0 %v2609_v28 }
 0x2f5   :  { %2290 = vmatpush3.bf16.msra.mxu0 %v2609_v28 }
 0x2f6   :  { %2291 = vmatprep.subr.bf16.mxu0 %v2610_v29 }
 0x2f9   :  { %2292 = vmatpush3.bf16.msra.mxu0 %v2610_v29 }
 0x2fa   :  { %2293 = vmatprep.subr.bf16.mxu0 %v2611_v30 }
 0x2fd   :  { %2294 = vmatpush3.bf16.msra.mxu0 %v2611_v30 }
 0x2fe   :  { %2295 = vmatprep.subr.bf16.mxu0 %v2612_v20 }
 0x301   :  { %2296 = vmatpush3.bf16.msra.mxu0 %v2612_v20 }
 0x302   :  { %2297 = vmatprep.subr.bf16.mxu0 %v2613_v31 }
 0x305   :  { %2298 = vmatpush3.bf16.msra.mxu0 %v2613_v31 }
 0x306   :  { %2299 = vmatprep.subr.bf16.mxu0 %v2614_v32 }
 0x309   :  { %2300 = vmatpush3.bf16.msra.mxu0 %v2614_v32 }
 0x30a   :  { %2305 = vmatprep.subr.bf16.mxu0 %v2615_v38 }
 0x30c   :  { %2302 = vmatmul.mubr.bf16.vlgmr.msra.gmra.mrb[4].mxu0 %v746_v41 }
 0x30d   :  { %2306 = vmatpush3.bf16.msra.mxu0 %v2615_v38  ;;  %2321 = vmatprep.mubr.bf16.mxu0 %v1010_v43 }
 0x30e   :  { %2307 = vmatprep.subr.bf16.mxu0 %v2616_v42 }
 0x311   :  { %2308 = vmatpush3.bf16.msra.mxu0 %v2616_v42 }
 0x312   :  { %2309 = vmatprep.subr.bf16.mxu0 %v2617_v44 }
 0x315   :  { %2310 = vmatpush3.bf16.msra.mxu0 %v2617_v44 }
 0x316   :  { %2311 = vmatprep.subr.bf16.mxu0 %v2618_v45 }
 0x319   :  { %2312 = vmatpush3.bf16.msra.mxu0 %v2618_v45 }
 0x31a   :  { %2313 = vmatprep.subr.bf16.mxu0 %v2619_v46 }
 0x31d   :  { %2314 = vmatpush3.bf16.msra.mxu0 %v2619_v46 }
 0x31e   :  { %2315 = vmatprep.subr.bf16.mxu0 %v2620_v47 }
 0x321   :  { %2316 = vmatpush3.bf16.msra.mxu0 %v2620_v47 }
 0x322   :  { %2317 = vmatprep.subr.bf16.mxu0 %v2621_v48 }
 0x325   :  { %2318 = vmatpush3.bf16.msra.mxu0 %v2621_v48 }
 0x326   :  { %2319 = vmatprep.subr.bf16.mxu0 %v2622_v49 }
 0x329   :  { %2320 = vmatpush3.bf16.msra.mxu0 %v2622_v49 }
 0x32c   :  { %2322 = vmatmul.mubr.bf16.vlgmr.msra.gmra.mrb[4].mxu0 %v1011_v27 }
 0x3ff   :  { %v2323_v50 = vpop.f32.mrb[4].mxu0 }
 0x400   :  { %v1111_v17 = vpop.f32.mrb[5].mxu0  ;;  %v3101_v21 = vadd.f32 %v2323_v50, %v2007_v51 }
 0x401   :  { %v2324_v52 = vpop.f32.mrb[6].mxu0  ;;  %v3097_v18 = vadd.f32 %v2007_v51, %v1111_v17 }
 0x402   :  { %v1114_v53 = vpop.f32.mrb[7].mxu0  ;;  %v3105_v56 = vadd.f32 %v2324_v52, %v2007_v51  ;;  %v1151_v13 = vmul.f32 %v3101_v21, %v3101_v21 }
 0x403   :  { %v3099_v19 = vadd.f32 %v2007_v51, %v1114_v53  ;;  %v1149_v7 = vmul.f32 %v3097_v18, %v3097_v18 }
 0x404   :  { %v1152_v15 = vmul.f32 %v3105_v56, %v3105_v56 }
 0x405   :  { %v1140_v54 = vadd.f32 %v3099_v19, %v3097_v18  ;;  %v1150_v4 = vmul.f32 %v3099_v19, %v3099_v19 }
 0x407   :  { %v1141_v59 = vadd.f32 %v1140_v54, %v3101_v21  ;;  %v1153_v10 = vadd.f32 %v1150_v4, %v1149_v7 }
 0x409   :  { %v1142_v60 = vadd.f32 %v1141_v59, %v3105_v56  ;;  %v1154_v14 = vadd.f32 %v1153_v10, %v1151_v13 }
 0x40b   :  { %v1143_v62 = vrot.slane %v1142_v60, 4  ;;  %v1155_v16 = vadd.f32 %v1154_v14, %v1152_v15 }
 0x40d   :  { %v1144_v63 = vadd.f32 %v1143_v62, %v1142_v60  ;;  %v1156_v22 = vrot.slane %v1155_v16, 4 }
 0x40f   :  { %v1145_v2 = vrot.slane %v1144_v63, 2 }
 0x411   :  { %v1146_v6 = vadd.f32 %v1145_v2, %v1144_v63 }
 0x413   :  { %v1147_v9 = vrot.slane %v1146_v6, 1 }
 0x415   :  { %v1148_v12 = vadd.f32 %v1147_v9, %v1146_v6 }
 0x417   :  { %2358 = vmatmul.mubr.f32.vlgmr.msra.gmra.mrb[4].mxu1 %v1148_v12 }
 0x418   :  { %2502 = vmatpush3.bf16.msra.mxu1 %v2762_v35  ;;  %2392 = vmatprep.mubr.msk.f32.mxu1 %vm2629_vm4, %v2627_v1  ;;  %v1157_v1 = vadd.f32 %v1156_v22, %v1155_v16  ;;  %vm3404_vm4 = vmmov %vm3402_vm2 }
 0x419   :  { %2503 = vmatprep.subr.bf16.mxu1 %v2628_v3 }
 0x41a   :  { %v1158_v35 = vrot.slane %v1157_v1, 2 }
 0x41c   :  { %2505 = vmatpush3.bf16.msra.mxu1 %v2766_v36  ;;  %v1159_v36 = vadd.f32 %v1158_v35, %v1157_v1 }
 0x41d   :  { %2506 = vmatprep.subr.bf16.mxu1 %v2628_v3 }
 0x420   :  { %2508 = vmatpush3.bf16.msra.mxu1 %v2807_v58  ;;  %v1160_v58 = vrot.slane %v1159_v36, 1 }
 0x421   :  { %2509 = vmatprep.subr.bf16.mxu1 %v2628_v3 }
 0x424   :  { %2511 = vmatpush3.bf16.msra.mxu1 %v2817_v61  ;;  %v1161_v61 = vadd.f32 %v1160_v58, %v1159_v36 }
 0x425   :  { %2512 = vmatprep.subr.bf16.mxu1 %v2628_v3 }
 0x428   :  { %2514 = vmatpush3.bf16.msra.mxu1 %v2827_v0 }
 0x429   :  { %2515 = vmatprep.subr.bf16.mxu1 %v2628_v3 }
 0x42c   :  { %2517 = vmatpush3.bf16.msra.mxu1 %v2837_v5 }
 0x42d   :  { %2518 = vmatprep.subr.bf16.mxu1 %v2628_v3 }
 0x430   :  { %2520 = vmatpush3.bf16.msra.mxu1 %v2847_v8  ;;  %v1322_v8 = vld [vmem:[%s3393_s5] sm:$0x1] }
 0x431   :  { %2521 = vmatprep.subr.bf16.mxu1 %v2628_v3 }
 0x434   :  { %2523 = vmatpush3.bf16.msra.mxu1 %v2858_v11  ;;  %v1326_v11 = vld [vmem:[%s3394_s6] sm:$0x1] }
 0x437   :  { %2393 = vmatmul.mubr.f32.vlgmr.msra.gmra.mrb[6].mxu1 %v1161_v61 }
 0x4ea   :  { %v1244_v23 = vpop.f32.mrb[4].mxu1 }
 0x4eb   :  { %v2359_v24 = vpop.f32.mrb[5].mxu1  ;;  %v1318_v0 = vmul.f32 0.001953125, %v1244_v23 }
 0x4ed   :  { %v1320_v26 = vmul.f32 %v1318_v0, %v1318_v0 }
 0x50a   :  { %v1314_v25 = vpop.f32.mrb[6].mxu1 }
 0x50b   :  { %v1319_v27 = vmul.f32 0.001953125, %v1314_v25  ;;  %v2394_v28 = vpop.f32.mrb[7].mxu1 }
 0x50d   :  { %v1321_v5 = vsub.f32 %v1319_v27, %v1320_v26 }
 0x50f   :  { %v1323_v29 = vadd.f32 1e-05, %v1321_v5 }
 0x511   :  { %2625 = vrsqrt.f32 %v1323_v29 }
 0x51b   :  { %v2626_v3 = vpop.eup %2625 }
 0x51c   :  { %v1325_v30 = vmul.f32 %v2626_v3, %v1322_v8 }
 0x51e   :  { %v1327_v20 = vmul.f32 %v1325_v30, %v1318_v0  ;;  %v1333_v31 = vrot.slane %v1325_v30, %v2928_v57 }
 0x520   :  { %v1328_v32 = vsub.f32 %v1326_v11, %v1327_v20  ;;  %1337 = vrot.lane.b32.xlu1 %v1333_v31, %s2632_s11  ;;  %1334 = vrot.lane.b32.xlu0 %v1333_v31, %s2631_s10 }
 0x522   :  { %v1398_v33 = vrot.slane %v1328_v32, %v2928_v57 }
 0x524   :  { %1340 = vrot.lane.b32.xlu0 %v1333_v31, %s2630_s30  ;;  %1399 = vrot.lane.b32.xlu1 %v1398_v33, %s2631_s10 }
 0x528   :  { %1343 = vrot.lane.b32.xlu0 %v1333_v31, %s2633_s12  ;;  %1402 = vrot.lane.b32.xlu1 %v1398_v33, %s2632_s11 }
 0x52c   :  { %1346 = vrot.lane.b32.xlu0 %v1333_v31, %s2634_s13  ;;  %1405 = vrot.lane.b32.xlu1 %v1398_v33, %s2630_s30 }
 0x530   :  { %1349 = vrot.lane.b32.xlu0 %v1333_v31, %s2635_s14  ;;  %1408 = vrot.lane.b32.xlu1 %v1398_v33, %s2633_s12 }
 0x534   :  { %1352 = vrot.lane.b32.xlu0 %v1333_v31, %s2636_s15  ;;  %1411 = vrot.lane.b32.xlu1 %v1398_v33, %s2634_s13 }
 0x538   :  { %1355 = vrot.lane.b32.xlu0 %v1333_v31, %s2637_s16  ;;  %1414 = vrot.lane.b32.xlu1 %v1398_v33, %s2635_s14 }
 0x53c   :  { %1358 = vrot.lane.b32.xlu0 %v1333_v31, %s2638_s17  ;;  %1417 = vrot.lane.b32.xlu1 %v1398_v33, %s2636_s15 }
 0x540   :  { %1361 = vrot.lane.b32.xlu0 %v1333_v31, %s2639_s18  ;;  %1420 = vrot.lane.b32.xlu1 %v1398_v33, %s2637_s16 }
 0x544   :  { %1364 = vrot.lane.b32.xlu0 %v1333_v31, %s2640_s23  ;;  %1423 = vrot.lane.b32.xlu1 %v1398_v33, %s2638_s17 }
 0x548   :  { %1367 = vrot.lane.b32.xlu0 %v1333_v31, %s2641_s24  ;;  %1426 = vrot.lane.b32.xlu1 %v1398_v33, %s2639_s18 }
 0x54c   :  { %1370 = vrot.lane.b32.xlu0 %v1333_v31, %s2642_s0  ;;  %1429 = vrot.lane.b32.xlu1 %v1398_v33, %s2640_s23 }
 0x550   :  { %1373 = vrot.lane.b32.xlu0 %v1333_v31, %s2643_s2  ;;  %1432 = vrot.lane.b32.xlu1 %v1398_v33, %s2641_s24 }
 0x554   :  { %1376 = vrot.lane.b32.xlu0 %v1333_v31, %s2644_s1  ;;  %1435 = vrot.lane.b32.xlu1 %v1398_v33, %s2642_s0  ;;  %v2645_v31 = vmov 1983009808  }
 0x558   :  { %1438 = vrot.lane.b32.xlu0 %v1398_v33, %s2643_s2  ;;  %1441 = vrot.lane.b32.xlu1 %v1398_v33, %s2644_s1 }
 0x592   :  { %v1338_v34 = vpop.permute.xlu1 %1337  ;;  %v1335_v37 = vpop.permute.xlu0 %1334 }
 0x593   :  { %v1379_v59 = vsel %vm612_vm5, %v1325_v30, %v1335_v37 }
 0x594   :  { %v1380_v60 = vsel %vm614_vm6, %v1379_v59, %v1338_v34 }
 0x596   :  { %v1341_v38 = vpop.permute.xlu0 %1340  ;;  %v1400_v39 = vpop.permute.xlu1 %1399 }
 0x597   :  { %v1381_v2 = vsel %vm3402_vm2, %v1380_v60, %v1341_v38  ;;  %v1444_v7 = vsel %vm612_vm5, %v1328_v32, %v1400_v39  ;;  %vm3406_vm5 = vcmask 982016   ;;  %v1489_v32 = vunpack.c.l.s4 %v2645_v31  ;;  %v1721_v31 = vld [vmem:[%s3397_s8 + $0x30] sm:$0xff] }
 0x59a   :  { %v1344_v40 = vpop.permute.xlu0 %1343  ;;  %v1403_v41 = vpop.permute.xlu1 %1402 }
 0x59b   :  { %v1382_v4 = vsel %vm3403_vm3, %v1381_v2, %v1344_v40  ;;  %v1445_v13 = vsel %vm614_vm6, %v1444_v7, %v1403_v41  ;;  %vm3407_vm6 = vmmov %vm3406_vm5 }
 0x59e   :  { %v1347_v42 = vpop.permute.xlu0 %1346  ;;  %v1406_v43 = vpop.permute.xlu1 %1405 }
 0x59f   :  { %v1383_v6 = vsel %vm620_vm9, %v1382_v4, %v1347_v42  ;;  %v1446_v15 = vsel %vm3404_vm4, %v1445_v13, %v1406_v43  ;;  %v1490_v42 = vunpack.c.0.s8 %v1489_v32  ;;  %v1722_v32 = vld [vmem:[%s3397_s8 + $0x38] sm:$0xff] }
 0x5a2   :  { %v1350_v44 = vpop.permute.xlu0 %1349  ;;  %v1409_v45 = vpop.permute.xlu1 %1408 }
 0x5a3   :  { %v1384_v9 = vsel %vm622_vm10, %v1383_v6, %v1350_v44  ;;  %v1447_v22 = vsel %vm3405_vm8, %v1446_v15, %v1409_v45  ;;  %v1716_v15 = vld [vmem:[%s3397_s8 + $0x8] sm:$0xff]  ;;  %vm1812_vm8 = vcmask 1042434  }
 0x5a6   :  { %v1353_v46 = vpop.permute.xlu0 %1352  ;;  %v1412_v47 = vpop.permute.xlu1 %1411 }
 0x5a7   :  { %v1385_v14 = vsel %vm624_vm11, %v1384_v9, %v1353_v46  ;;  %v1448_v35 = vsel %vm620_vm9, %v1447_v22, %v1412_v47  ;;  %vm1814_vm9 = vcmask 1043459  }
 0x5aa   :  { %v1356_v48 = vpop.permute.xlu0 %1355  ;;  %v1415_v49 = vpop.permute.xlu1 %1414 }
 0x5ab   :  { %v1386_v16 = vsel %vm42_vm1, %v1385_v14, %v1356_v48  ;;  %v1449_v23 = vsel %vm622_vm10, %v1448_v35, %v1415_v49  ;;  %v1715_v14 = vld [vmem:[%s3397_s8] sm:$0xff]  ;;  %vm1816_vm10 = vcmask 1044484  }
 0x5ae   :  { %v1359_v50 = vpop.permute.xlu0 %1358  ;;  %v1418_v51 = vpop.permute.xlu1 %1417 }
 0x5af   :  { %v1387_v1 = vsel %vm627_vm12, %v1386_v16, %v1359_v50  ;;  %v1450_v0 = vsel %vm624_vm11, %v1449_v23, %v1418_v51  ;;  %vm1818_vm11 = vcmask 1045509  }
 0x5b2   :  { %v1362_v17 = vpop.permute.xlu0 %1361  ;;  %v1421_v52 = vpop.permute.xlu1 %1420 }
 0x5b3   :  { %v1388_v36 = vsel %vm629_vm13, %v1387_v1, %v1362_v17  ;;  %v1451_v26 = vsel %vm42_vm1, %v1450_v0, %v1421_v52  ;;  %v3209_v17 = vsub.s32 %v1490_v42, %v2922_v55  ;;  %v1717_v0 = vld [vmem:[%s3397_s8 + $0x10] sm:$0xff]  ;;  %v2536_v42 = vpack.c.bf16 %v1722_v32, %v1721_v31 }
 0x5b6   :  { %v1365_v53 = vpop.permute.xlu0 %1364  ;;  %v1424_v54 = vpop.permute.xlu1 %1423 }
 0x5b7   :  { %v1389_v24 = vsel %vm631_vm14, %v1388_v36, %v1365_v53  ;;  %v1452_v28 = vsel %vm627_vm12, %v1451_v26, %v1424_v54  ;;  %v1719_v26 = vld [vmem:[%s3397_s8 + $0x20] sm:$0xff]  ;;  %vm1820_vm12 = vcmask 1046534  }
 0x5ba   :  { %v1368_v62 = vpop.permute.xlu0 %1367  ;;  %v1427_v63 = vpop.permute.xlu1 %1426 }
 0x5bb   :  { %v1390_v25 = vsel %vm633_vm15, %v1389_v24, %v1368_v62  ;;  %v1453_v3 = vsel %vm629_vm13, %v1452_v28, %v1427_v63  ;;  %v2524_v24 = vpack.c.bf16 %v1716_v15, %v1715_v14  ;;  %vm1822_vm13 = vcmask 1047559  }
 0x5bd   :  { %2525 = vmatprep.subr.bf16.mxu1 %v2524_v24 }
 0x5be   :  { %v1371_v10 = vpop.permute.xlu0 %1370  ;;  %v1430_v12 = vpop.permute.xlu1 %1429  ;;  %2527 = vmatpush3.bf16.msra.mxu1 %v2524_v24 }
 0x5bf   :  { %v1391_v27 = vsel %vm635_vm0, %v1390_v25, %v1371_v10  ;;  %v1454_v11 = vsel %vm631_vm14, %v1453_v3, %v1430_v12  ;;  %v1718_v25 = vld [vmem:[%s3397_s8 + $0x18] sm:$0xff]  ;;  %vm3408_vm14 = vmmov %vm3406_vm5 }
 0x5c2   :  { %v1374_v58 = vpop.permute.xlu0 %1373  ;;  %v1433_v61 = vpop.permute.xlu1 %1432 }
 0x5c3   :  { %v1392_v5 = vsel %vm637_vm7, %v1391_v27, %v1374_v58  ;;  %v1455_v33 = vsel %vm633_vm15, %v1454_v11, %v1433_v61  ;;  %v1720_v27 = vld [vmem:[%s3397_s8 + $0x28] sm:$0xff]  ;;  %v2528_v11 = vpack.c.bf16 %v1718_v25, %v1717_v0  ;;  %vm3409_vm15 = vmmov %vm3406_vm5 }
 0x5c5   :  { %2529 = vmatprep.subr.bf16.mxu1 %v2528_v11 }
 0x5c6   :  { %v1377_v29 = vpop.permute.xlu0 %1376  ;;  %v1436_v8 = vpop.permute.xlu1 %1435  ;;  %2531 = vmatpush3.bf16.msra.mxu1 %v2528_v11 }
 0x5c7   :  { %v1393_v30 = vsel %vm3406_vm5, %v1392_v5, %v1377_v29  ;;  %v1456_v34 = vsel %vm635_vm0, %v1455_v33, %v1436_v8 }
 0x5c8   :  { %v1462_v20 = vrot.slane %v1393_v30, %v2928_v57 }
 0x5ca   :  { %v1439_v37 = vpop.permute.xlu0 %1438  ;;  %v1442_v38 = vpop.permute.xlu1 %1441  ;;  %v1463_v40 = vmul.f32 %v1462_v20, %v3097_v18  ;;  %v1464_v43 = vmul.f32 %v1462_v20, %v3099_v19  ;;  %v1465_v44 = vmul.f32 %v1462_v20, %v3101_v21  ;;  %v1466_v45 = vmul.f32 %v1462_v20, %v3105_v56 }
 0x5cb   :  { %v1457_v39 = vsel %vm637_vm7, %v1456_v34, %v1439_v37  ;;  %v2532_v20 = vpack.c.bf16 %v1720_v27, %v1719_v26  ;;  %vm1810_vm7 = vcmask 1041409  }
 0x5cc   :  { %v1458_v41 = vsel %vm3407_vm6, %v1457_v39, %v1442_v38 }
 0x5cd   :  { %v1470_v46 = vrot.slane %v1458_v41, %v2928_v57  ;;  %2533 = vmatprep.subr.bf16.mxu1 %v2532_v20 }
 0x5ce   :  { %2535 = vmatpush3.bf16.msra.mxu1 %v2532_v20 }
 0x5cf   :  { %v1471_v47 = vadd.f32 %v1470_v46, %v1463_v40  ;;  %v1472_v48 = vadd.f32 %v1470_v46, %v1464_v43  ;;  %v1473_v49 = vadd.f32 %v1470_v46, %v1465_v44  ;;  %v1474_v50 = vadd.f32 %v1470_v46, %v1466_v45  ;;  %v1723_v43 = vld [vmem:[%s3397_s8 + $0x40] sm:$0xff]  ;;  %v1724_v44 = vld [vmem:[%s3397_s8 + $0x48] sm:$0xff]  ;;  %2537 = vmatprep.subr.bf16.mxu1 %v2536_v42 }
 0x5d1   :  { %v1477_v51 = vmul.f32 0.2, %v1473_v49  ;;  %v1475_v18 = vmul.f32 0.2, %v1471_v47  ;;  %v1476_v52 = vmul.f32 0.2, %v1472_v48 }
 0x5d2   :  { %v1478_v53 = vmul.f32 0.2, %v1474_v50  ;;  %2539 = vmatpush3.bf16.msra.mxu1 %v2536_v42 }
 0x5d3   :  { %v1481_v54 = vmax.f32 %v1473_v49, %v1477_v51  ;;  %v1479_v59 = vmax.f32 %v1471_v47, %v1475_v18  ;;  %v1480_v19 = vmax.f32 %v1472_v48, %v1476_v52  ;;  %v2540_v18 = vpack.c.bf16 %v1724_v44, %v1723_v43  ;;  %v1725_v52 = vld [vmem:[%s3397_s8 + $0x50] sm:$0xff] }
 0x5d4   :  { %v3211_v60 = vmax.f32 %v1474_v50, %v1478_v53  ;;  %v1726_v53 = vld [vmem:[%s3397_s8 + $0x58] sm:$0xff] }
 0x5d5   :  { %v1528_v21 = vrot.slane %v1481_v54, %v3209_v17  ;;  %v1494_v56 = vrot.slane %v1479_v59, %v3209_v17  ;;  %v1511_v62 = vrot.slane %v1480_v19, %v3209_v17  ;;  %v1487_v63 = vcombine.high %v1479_v59, %v1479_v59  ;;  %2541 = vmatprep.subr.bf16.mxu1 %v2540_v18 }
 0x5d6   :  { %v1545_v2 = vrot.slane %v3211_v60, %v3209_v17  ;;  %v1504_v35 = vcombine.high %v1480_v19, %v1480_v19  ;;  %v1521_v23 = vcombine.high %v1481_v54, %v1481_v54  ;;  %v1538_v37 = vcombine.high %v3211_v60, %v3211_v60  ;;  %2543 = vmatpush3.bf16.msra.mxu1 %v2540_v18 }
 0x5d7   :  { %v2016_v55 = vrot.slane %v1528_v21, 9  ;;  %v2008_v4 = vrot.slane %v1494_v56, 9  ;;  %v2012_v6 = vrot.slane %v1511_v62, 9  ;;  %v1502_v7 = vcombine.high %v1494_v56, %v1494_v56 }
 0x5d8   :  { %v2020_v12 = vrot.slane %v1545_v2, 9  ;;  %v1501_v13 = vrot.slane %v1487_v63, %v3209_v17  ;;  %v1519_v22 = vcombine.high %v1511_v62, %v1511_v62  ;;  %v1536_v1 = vcombine.high %v1528_v21, %v1528_v21 }
 0x5d9   :  { %v3218_v9 = vmax.f32 %v1528_v21, %v2016_v55  ;;  %v3220_v10 = vmax.f32 %v1494_v56, %v2008_v4  ;;  %v2009_v16 = vrot.slane %v1502_v7, 9  ;;  %v3233_v36 = vmax.f32 %v1511_v62, %v2012_v6  ;;  %v1727_v56 = vld [vmem:[%s3397_s8 + $0x60] sm:$0xff]  ;;  %v1728_v62 = vld [vmem:[%s3397_s8 + $0x68] sm:$0xff] }
 0x5da   :  { %v3235_v58 = vmax.f32 %v1545_v2, %v2020_v12  ;;  %v2010_v61 = vrot.slane %v1501_v13, 9  ;;  %v2013_v5 = vrot.slane %v1519_v22, 9  ;;  %v2017_v29 = vrot.slane %v1536_v1, 9 }
 0x5db   :  { %1667 = vrot.lane.b32.xlu1 %v3218_v9, %s2644_s1  ;;  %1651 = vrot.lane.b32.xlu0 %v3220_v10, %s2644_s1  ;;  %v3253_v28 = vmax.f32 %v1502_v7, %v2009_v16  ;;  %v1518_v3 = vrot.slane %v1504_v35, %v3209_v17  ;;  %v1535_v30 = vrot.slane %v1521_v23, %v3209_v17 }
 0x5dc   :  { %v3255_v8 = vmax.f32 %v1501_v13, %v2010_v61  ;;  %v3269_v33 = vmax.f32 %v1519_v22, %v2013_v5  ;;  %v1553_v34 = vcombine.high %v1545_v2, %v1545_v2  ;;  %v3273_v38 = vmax.f32 %v1536_v1, %v2017_v29 }
 0x5dd   :  { %v2014_v39 = vrot.slane %v1518_v3, 9  ;;  %v2018_v40 = vrot.slane %v1535_v30, 9  ;;  %v1503_v41 = vcombine.high %v1501_v13, %v1501_v13  ;;  %v1537_v46 = vcombine.high %v1535_v30, %v1535_v30  ;;  %v1729_v13 = vld [vmem:[%s3397_s8 + $0x70] sm:$0xff] }
 0x5de   :  { %v2021_v45 = vrot.slane %v1553_v34, 9  ;;  %v1520_v47 = vcombine.high %v1518_v3, %v1518_v3  ;;  %v1552_v51 = vrot.slane %v1538_v37, %v3209_v17  ;;  %v2544_v21 = vpack.c.bf16 %v1726_v53, %v1725_v52 }
 0x5df   :  { %1659 = vrot.lane.b32.xlu1 %v3233_v36, %s2644_s1  ;;  %1675 = vrot.lane.b32.xlu0 %v3235_v58, %s2644_s1  ;;  %v3285_v48 = vmax.f32 %v1518_v3, %v2014_v39  ;;  %v3287_v49 = vmax.f32 %v1535_v30, %v2018_v40  ;;  %v2011_v50 = vrot.slane %v1503_v41, 9  ;;  %v2019_v54 = vrot.slane %v1537_v46, 9 }
 0x5e0   :  { %v3300_v59 = vmax.f32 %v1553_v34, %v2021_v45  ;;  %v2015_v19 = vrot.slane %v1520_v47, 9  ;;  %v1554_v60 = vcombine.high %v1552_v51, %v1552_v51  ;;  %v2022_v55 = vrot.slane %v1552_v51, 9  ;;  %2545 = vmatprep.subr.bf16.mxu1 %v2544_v21 }
 0x5e1   :  { %v3302_v17 = vmax.f32 %v1503_v41, %v2011_v50  ;;  %v3314_v63 = vmax.f32 %v1537_v46, %v2019_v54  ;;  %v2548_v6 = vpack.c.bf16 %v1728_v62, %v1727_v56  ;;  %2547 = vmatpush3.bf16.msra.mxu1 %v2544_v21 }
 0x5e2   :  { %v3316_v2 = vmax.f32 %v1520_v47, %v2015_v19  ;;  %v2023_v4 = vrot.slane %v1554_v60, 9  ;;  %v3322_v7 = vmax.f32 %v1552_v51, %v2022_v55 }
 0x5e3   :  { %1653 = vrot.lane.b32.xlu1 %v3253_v28, %s2644_s1  ;;  %1655 = vrot.lane.b32.xlu0 %v3255_v8, %s2644_s1 }
 0x5e4   :  { %v3324_v12 = vmax.f32 %v1554_v60, %v2023_v4  ;;  %2549 = vmatprep.subr.bf16.mxu1 %v2548_v6 }
 0x5e5   :  { %2551 = vmatpush3.bf16.msra.mxu1 %v2548_v6 }
 0x5e6   :  { %2423 = vmatprep.subr.mxu1 %v1729_v13 }
 0x5e7   :  { %1661 = vrot.lane.b32.xlu1 %v3269_v33, %s2644_s1  ;;  %1669 = vrot.lane.b32.xlu0 %v3273_v38, %s2644_s1 }
 0x5e9   :  { %2424 = vmatpush3.msra.mxu1 %v1729_v13 }
 0x5eb   :  { %1663 = vrot.lane.b32.xlu1 %v3285_v48, %s2644_s1  ;;  %1671 = vrot.lane.b32.xlu0 %v3287_v49, %s2644_s1 }
 0x5ef   :  { %1677 = vrot.lane.b32.xlu0 %v3300_v59, %s2644_s1  ;;  %1657 = vrot.lane.b32.xlu1 %v3302_v17, %s2644_s1 }
 0x5f3   :  { %1673 = vrot.lane.b32.xlu0 %v3314_v63, %s2644_s1  ;;  %1665 = vrot.lane.b32.xlu1 %v3316_v2, %s2644_s1 }
 0x5f7   :  { %1679 = vrot.lane.b32.xlu0 %v3322_v7, %s2644_s1  ;;  %1681 = vrot.lane.b32.xlu1 %v3324_v12, %s2644_s1 }
 0x64d   :  { %v1668_v14 = vpop.permute.xlu1 %1667  ;;  %v1652_v15 = vpop.permute.xlu0 %1651 }
 0x64e   :  { %v1699_v0 = vmax.f32 %v3220_v10, %v1652_v15  ;;  %v1707_v29 = vmax.f32 %v3218_v9, %v1668_v14 }
 0x650   :  { %v1749_v3 = vrot.slane %v1699_v0, %v2928_v57 }
 0x651   :  { %v1660_v16 = vpop.permute.xlu1 %1659  ;;  %v1676_v22 = vpop.permute.xlu0 %1675 }
 0x652   :  { %v1703_v11 = vmax.f32 %v3233_v36, %v1660_v16  ;;  %v1781_v36 = vrot.slane %v1707_v29, %v2928_v57  ;;  %v1711_v37 = vmax.f32 %v3235_v58, %v1676_v22 }
 0x654   :  { %v1765_v40 = vrot.slane %v1703_v11, %v2928_v57  ;;  %v1797_v53 = vrot.slane %v1711_v37, %v2928_v57 }
 0x655   :  { %v1654_v1 = vpop.permute.xlu1 %1653  ;;  %v1656_v35 = vpop.permute.xlu0 %1655 }
 0x656   :  { %v1700_v24 = vmax.f32 %v3253_v28, %v1654_v1  ;;  %v1701_v25 = vmax.f32 %v3255_v8, %v1656_v35 }
 0x658   :  { %v1753_v5 = vrot.slane %v1700_v24, %v2928_v57  ;;  %v1757_v28 = vrot.slane %v1701_v25, %v2928_v57 }
 0x659   :  { %v1662_v61 = vpop.permute.xlu1 %1661  ;;  %v1670_v23 = vpop.permute.xlu0 %1669 }
 0x65a   :  { %v1708_v30 = vmax.f32 %v3273_v38, %v1670_v23  ;;  %v1811_v31 = vsel %vm1810_vm7, %v1753_v5, %v1749_v3  ;;  %v1704_v32 = vmax.f32 %v3269_v33, %v1662_v61 }
 0x65b   :  { %v1813_v33 = vsel %vm1812_vm8, %v1757_v28, %v1811_v31 }
 0x65c   :  { %v1785_v38 = vrot.slane %v1708_v30, %v2928_v57  ;;  %v1769_v45 = vrot.slane %v1704_v32, %v2928_v57 }
 0x65d   :  { %v1664_v26 = vpop.permute.xlu1 %1663  ;;  %v1672_v27 = vpop.permute.xlu0 %1671 }
 0x65e   :  { %v1709_v10 = vmax.f32 %v3287_v49, %v1672_v27  ;;  %v1705_v34 = vmax.f32 %v3285_v48, %v1664_v26  ;;  %v1824_v50 = vsel %vm1810_vm7, %v1785_v38, %v1781_v36 }
 0x660   :  { %v1789_v41 = vrot.slane %v1709_v10, %v2928_v57  ;;  %v1773_v48 = vrot.slane %v1705_v34, %v2928_v57 }
 0x661   :  { %v1678_v20 = vpop.permute.xlu0 %1677  ;;  %v1658_v8 = vpop.permute.xlu1 %1657 }
 0x662   :  { %v1702_v9 = vmax.f32 %v3302_v17, %v1658_v8  ;;  %v1712_v42 = vmax.f32 %v3300_v59, %v1678_v20  ;;  %v1825_v54 = vsel %vm1812_vm8, %v1789_v41, %v1824_v50 }
 0x664   :  { %v1761_v39 = vrot.slane %v1702_v9, %v2928_v57  ;;  %v1801_v59 = vrot.slane %v1712_v42, %v2928_v57 }
 0x665   :  { %v1674_v43 = vpop.permute.xlu0 %1673  ;;  %v1666_v44 = vpop.permute.xlu1 %1665 }
 0x666   :  { %v1815_v46 = vsel %vm1814_vm9, %v1761_v39, %v1813_v33  ;;  %v1710_v58 = vmax.f32 %v3314_v63, %v1674_v43  ;;  %v1706_v47 = vmax.f32 %v3316_v2, %v1666_v44 }
 0x667   :  { %v1817_v49 = vsel %vm1816_vm10, %v1765_v40, %v1815_v46 }
 0x668   :  { %v1793_v51 = vrot.slane %v1710_v58, %v2928_v57  ;;  %v1777_v18 = vrot.slane %v1706_v47, %v2928_v57  ;;  %v1819_v52 = vsel %vm1818_vm11, %v1769_v45, %v1817_v49 }
 0x669   :  { %v1680_v17 = vpop.permute.xlu0 %1679  ;;  %v1682_v19 = vpop.permute.xlu1 %1681  ;;  %v1821_v60 = vsel %vm1820_vm12, %v1773_v48, %v1819_v52 }
 0x66a   :  { %v1826_v21 = vsel %vm1814_vm9, %v1793_v51, %v1825_v54  ;;  %v1713_v56 = vmax.f32 %v3322_v7, %v1680_v17  ;;  %v1714_v62 = vmax.f32 %v3324_v12, %v1682_v19  ;;  %v1823_v63 = vsel %vm1822_vm13, %v1777_v18, %v1821_v60 }
 0x66b   :  { %v1827_v2 = vsel %vm1816_vm10, %v1797_v53, %v1826_v21  ;;  %2425 = vmatprep.mubr.msk.f32.mxu1 %vm3408_vm14, %v1823_v63 }
 0x66c   :  { %v1828_v55 = vsel %vm1818_vm11, %v1801_v59, %v1827_v2  ;;  %v1805_v4 = vrot.slane %v1713_v56, %v2928_v57  ;;  %v1809_v6 = vrot.slane %v1714_v62, %v2928_v57 }
 0x66e   :  { %v1829_v13 = vsel %vm1820_vm12, %v1805_v4, %v1828_v55 }
 0x66f   :  { %v1830_v14 = vsel %vm1822_vm13, %v1809_v6, %v1829_v13 }
 0x670   :  { %2426 = vmatmul.mubr.msk.f32.vlgmr.msra.gmra.mrb[8].mxu1 %vm3409_vm15, %v1830_v14 }
 0x743   :  { %v2427_v7 = vpop.f32.mrb[8].mxu1 }
 0x744   :  { %1911 = vst.msk [vmem:[%s3398_s9 + $0x8] sm:$0xff] %vm42_vm1, %v2427_v7  ;;  %v1901_v12 = vpop.f32.mrb[9].mxu1 }
 0x745   :  { %1910 = vst.msk [vmem:[%s3398_s9] sm:$0xff] %vm42_vm1, %v1901_v12 }

</bundles_post_ra>
